<compile_context>
chip_gen: v5e
topology: v5e:2x2
jax: 0.10.0
libtpu: 0.0.40
codegen_flags: <defaults>
</compile_context>

<pallas_src>
import functools

import numpy as np

import jax
import jax.numpy as jnp
from jax import lax
from jax.experimental import pallas as pl
from jax.experimental.pallas import tpu as pltpu

_RGB_WIDTH = 128            # lane width of the flat RGB slab
_LAB_WIDTH = 3 * 128        # one row = 128 interleaved RGB pixels (384 lanes)
_RGB_CHUNK = 1024           # rows per accumulation chunk: (1024,128) f32 = 512 KiB
_LAB_CHUNK = 256            # pixel-rows per chunk: (256,384) f32 = 384 KiB
_RGB_ROW_TILE = 16384       # rows per grid step  -> 8 MiB per input per buffer (f32)
_LAB_ROW_TILE = 4096        # pixel-rows per step -> 6 MiB per input per buffer (f32)
_VMEM_LIMIT = 40 * 1024 * 1024          # fits v5e/v6e (128 MiB) and v7x (64 MiB)
_MIN_KERNEL_ELEMENTS = 1 << 15          # below this, plain jnp beats a launch

# LAB linear map with the /2^16, 377/2^24, /2^24 scales folded in.
_LAB_M = np.array(
    [[13933.0 / 2.0 ** 16, 46871.0 / 2.0 ** 16, 4732.0 / 2.0 ** 16],
     [377.0 * 14503.0 / 2.0 ** 24, -377.0 * 22218.0 / 2.0 ** 24,
      377.0 * 7714.0 / 2.0 ** 24],
     [12773.0 / 2.0 ** 24, 39695.0 / 2.0 ** 24, -52468.0 / 2.0 ** 24]],
    dtype=np.float32)
# Block-diagonal map sending one 384-lane row of 128 interleaved RGB-difference
# triplets to the corresponding 128 interleaved LAB-difference triplets.
_LAB_W = np.kron(np.eye(128, dtype=np.float32), _LAB_M.T).astype(np.float32)


def _round_up(x, m):
    return ((x + m - 1) // m) * m


def _tile_plan(rows, row_tile, chunk):
    """tm (multiple of chunk), tiles (multiple of par), par."""
    tiles = max(1, pl.cdiv(rows, row_tile))
    par = 2 if tiles >= 2 else 1          # feed both v7x TensorCores
    tiles = _round_up(tiles, par)
    tm = _round_up(pl.cdiv(rows, tiles), chunk)
    return tm, tiles, par


def _prep_dtypes(pred, target):
    # Keep bf16/f16/f32 native (halves the HBM read for bf16); the upcast to
    # f32 happens in-register inside the kernel, BEFORE the subtract.
    if pred.dtype != target.dtype or not jnp.issubdtype(pred.dtype, jnp.floating):
        pred = pred.astype(jnp.float32)
        target = target.astype(jnp.float32)
    return pred, target


def _flat_rows(x, width):
    """Lane-dense (rows, width) view.  Zero-copy when size % width == 0."""
    flat = x.reshape(-1)
    n = flat.shape[0]
    rows = pl.cdiv(n, width)
    if n % width:
        # TODO(synk): this copy is only needed when the flat size is not a
        # lane multiple; a 1-D HBM view + manual DMA could remove it too.
        flat = jnp.pad(flat, (0, rows * width - n))
    return flat.reshape(rows, width)


# ------------------------------- kernels -------------------------------------

def _mse_rgb_kernel(p_ref, t_ref, out_ref, acc_ref, *, n_valid, tile_rows, chunk):
    c = pl.program_id(0)
    i = pl.program_id(1)
    steps = pl.num_programs(1)

    @pl.when(i == 0)
    def _():
        acc_ref[...] = jnp.zeros_like(acc_ref)

    # Flat-element offset of this *logical* (unclamped) tile; duplicated /
    # clamped tiles get base >= n_valid and therefore contribute nothing.
    base = (c * steps + i) * (tile_rows * _RGB_WIDTH)
    # Intra-chunk element index, hoisted out of the chunk loop.
    idx = (lax.broadcasted_iota(jnp.int32, (chunk, _RGB_WIDTH), 0) * _RGB_WIDTH
           + lax.broadcasted_iota(jnp.int32, (chunk, _RGB_WIDTH), 1))
    rem0 = n_valid - base

    @pl.loop(0, tile_rows // chunk)
    def _(j):
        off = pl.multiple_of(j * chunk, chunk)
        p = p_ref[pl.ds(off, chunk), :].astype(jnp.float32)
        t = t_ref[pl.ds(off, chunk), :].astype(jnp.float32)
        d = p - t
        rem = rem0 - j * (chunk * _RGB_WIDTH)
        # select (not multiply): OOB block contents are unspecified (NaN/Inf ok)
        acc_ref[...] += jnp.where(idx < rem, d * d, 0.0)

    @pl.when(i == steps - 1)
    def _():
        out_ref[...] = jnp.sum(acc_ref[...], keepdims=True) * (1.0 / n_valid)


def _mse_lab_kernel(p_ref, t_ref, w_ref, out_ref, acc_ref, *,
                    n_valid, tile_rows, chunk):
    c = pl.program_id(0)
    i = pl.program_id(1)
    steps = pl.num_programs(1)

    @pl.when(i == 0)
    def _():
        acc_ref[...] = jnp.zeros_like(acc_ref)

    base = (c * steps + i) * (tile_rows * _LAB_WIDTH)
    idx = (lax.broadcasted_iota(jnp.int32, (chunk, _LAB_WIDTH), 0) * _LAB_WIDTH
           + lax.broadcasted_iota(jnp.int32, (chunk, _LAB_WIDTH), 1))
    rem0 = n_valid - base
    w = w_ref[...]                        # resident kron(I_128, M^T) constant

    @pl.loop(0, tile_rows // chunk)
    def _(j):
        off = pl.multiple_of(j * chunk, chunk)
        p = p_ref[pl.ds(off, chunk), :].astype(jnp.float32)
        t = t_ref[pl.ds(off, chunk), :].astype(jnp.float32)
        rem = rem0 - j * (chunk * _LAB_WIDTH)
        # Mask BEFORE the matmul so OOB garbage cannot poison valid lanes.
        d = jnp.where(idx < rem, p - t, 0.0)
        y = jnp.dot(d, w, preferred_element_type=jnp.float32,
                    precision=lax.Precision.HIGHEST)
        acc_ref[...] += y * y

    @pl.when(i == steps - 1)
    def _():
        out_ref[...] = jnp.sum(acc_ref[...], keepdims=True) * (1.0 / n_valid)


# ------------------------------- wrappers -------------------------------------

def _rgb_to_lab_jnp(rgb):
    R, G, B = rgb[:, 0], rgb[:, 1], rgb[:, 2]
    L = (13933.0 * R + 46871.0 * G + 4732.0 * B) / 2.0 ** 16
    A = 377.0 * (14503.0 * R - 22218.0 * G + 7714.0 * B) / 2.0 ** 24 + 128.0
    b = (12773.0 * R + 39695.0 * G - 52468.0 * B) / 2.0 ** 24 + 128.0
    return jnp.stack([L, A, b], axis=1)


def _mse_reference_jnp(pred, target, space):
    """Pure-jnp reference (also used as the tiny-input fallback)."""
    p = pred.astype(jnp.float32)
    t = target.astype(jnp.float32)
    if space == "LAB":
        p = _rgb_to_lab_jnp(p.reshape(-1, 3))
        t = _rgb_to_lab_jnp(t.reshape(-1, 3))
    return jnp.mean((p - t) ** 2)


@jax.jit
def _mse_rgb(pred, target):
    n = int(pred.size)
    if n < _MIN_KERNEL_ELEMENTS:
        return _mse_reference_jnp(pred, target, "RGB")
    pred, target = _prep_dtypes(pred, target)
    p = _flat_rows(pred, _RGB_WIDTH)
    t = _flat_rows(target, _RGB_WIDTH)
    rows = p.shape[0]
    tm, tiles, par = _tile_plan(rows, _RGB_ROW_TILE, _RGB_CHUNK)
    steps = tiles // par
    max_block = pl.cdiv(rows, tm) - 1     # last block that starts in-bounds

    def idx_map(c, i):
        # Clamp so no block starts fully out of bounds; the kernel masks the
        # duplicate with the unclamped logical index.
        return (jnp.minimum(c * steps + i, max_block), 0)

    kernel = functools.partial(_mse_rgb_kernel, n_valid=n, tile_rows=tm,
                               chunk=_RGB_CHUNK)
    partials = pl.pallas_call(
        kernel,
        out_shape=jax.ShapeDtypeStruct((par, 1), jnp.float32),
        grid_spec=pltpu.PrefetchScalarGridSpec(
            num_scalar_prefetch=0,
            grid=(par, steps),
            in_specs=[pl.BlockSpec((tm, _RGB_WIDTH), idx_map),
                      pl.BlockSpec((tm, _RGB_WIDTH), idx_map)],
            out_specs=pl.BlockSpec((1, 1), lambda c, i: (c, 0)),
            scratch_shapes=[pltpu.VMEM((_RGB_CHUNK, _RGB_WIDTH), jnp.float32)]),
        compiler_params=pltpu.CompilerParams(
            dimension_semantics=("parallel", "arbitrary"),
            vmem_limit_bytes=_VMEM_LIMIT),
        cost_estimate=pl.CostEstimate(
            flops=3 * n, transcendentals=0,
            bytes_accessed=2 * n * pred.dtype.itemsize + 8),
    )(p, t)
    return jnp.sum(partials)


@jax.jit
def _mse_lab(pred, target):
    n = int(pred.size)
    assert n % 3 == 0, "LAB space expects interleaved RGB triplets (last dim 3)"
    if n < _MIN_KERNEL_ELEMENTS:
        return _mse_reference_jnp(pred, target, "LAB")
    pred, target = _prep_dtypes(pred, target)
    p = _flat_rows(pred, _LAB_WIDTH)
    t = _flat_rows(target, _LAB_WIDTH)
    rows = p.shape[0]
    tm, tiles, par = _tile_plan(rows, _LAB_ROW_TILE, _LAB_CHUNK)
    steps = tiles // par
    max_block = pl.cdiv(rows, tm) - 1
    w = jnp.asarray(_LAB_W)               # constant-folded under jit

    def idx_map(c, i):
        return (jnp.minimum(c * steps + i, max_block), 0)

    kernel = functools.partial(_mse_lab_kernel, n_valid=n, tile_rows=tm,
                               chunk=_LAB_CHUNK)
    partials = pl.pallas_call(
        kernel,
        out_shape=jax.ShapeDtypeStruct((par, 1), jnp.float32),
        grid_spec=pltpu.PrefetchScalarGridSpec(
            num_scalar_prefetch=0,
            grid=(par, steps),
            in_specs=[pl.BlockSpec((tm, _LAB_WIDTH), idx_map),
                      pl.BlockSpec((tm, _LAB_WIDTH), idx_map),
                      pl.BlockSpec((_LAB_WIDTH, _LAB_WIDTH), lambda c, i: (0, 0))],
            out_specs=pl.BlockSpec((1, 1), lambda c, i: (c, 0)),
            scratch_shapes=[pltpu.VMEM((_LAB_CHUNK, _LAB_WIDTH), jnp.float32)]),
        compiler_params=pltpu.CompilerParams(
            dimension_semantics=("parallel", "arbitrary"),
            vmem_limit_bytes=_VMEM_LIMIT),
        cost_estimate=pl.CostEstimate(
            flops=n * (2 * _LAB_WIDTH + 3), transcendentals=0,
            bytes_accessed=2 * n * pred.dtype.itemsize + _LAB_W.nbytes + 8),
    )(p, t, w)
    return jnp.sum(partials)


class Criterion:
    """JAX/Pallas port of the PyTorch Criterion module (forward only).

    NOTE: loss 'RMSE' is plain MSE, exactly as in the PyTorch reference.
    """

    _SPACES = ("RGB", "HSV", "Hue", "LAB")

    def __init__(self, loss="RMSE", space="RGB"):
        assert loss == "RMSE"             # only loss defined in the reference
        assert space in self._SPACES
        if space in ("HSV", "Hue"):
            # TODO(synk): HSV/Hue transforms not ported to the kernel.
            raise NotImplementedError("HSV/Hue color spaces not ported")
        self.space = space

    def __call__(self, pred, target):
        assert pred.shape == target.shape
        if self.space == "LAB":
            return _mse_lab(pred, target)
        return _mse_rgb(pred, target)


# ------------------------------- demo ----------------------------------------

if __name__ == "__main__":
    key = jax.random.PRNGKey(0)
    k1, k2, k3, k4, k5, k6 = jax.random.split(key, 6)

    crit_rgb = Criterion(loss="RMSE", space="RGB")
    crit_lab = Criterion(loss="RMSE", space="LAB")

    # 1) Lane-aligned batch of colors (zero-copy path), shape (16384, 3) f32.
    n1 = 16384
    p1 = jax.random.uniform(k1, (n1, 3), dtype=jnp.float32)
    t1 = jax.random.uniform(k2, (n1, 3), dtype=jnp.float32)
    got = jax.block_until_ready(crit_rgb(p1, t1))
    ref = _mse_reference_jnp(p1, t1, "RGB")
    assert jnp.allclose(got, ref, rtol=1e-5, atol=1e-7), (got, ref)
    got = jax.block_until_ready(crit_lab(p1, t1))
    ref = _mse_reference_jnp(p1, t1, "LAB")
    assert jnp.allclose(got, ref, rtol=5e-3, atol=1e-5), (got, ref)

    # 2) Ragged size (flat size not a multiple of 128 -> in-kernel tail mask).
    n2 = 16411
    p2 = jax.random.uniform(k3, (n2, 3), dtype=jnp.float32)
    t2 = jax.random.uniform(k4, (n2, 3), dtype=jnp.float32)
    assert jnp.allclose(jax.block_until_ready(crit_rgb(p2, t2)),
                        _mse_reference_jnp(p2, t2, "RGB"), rtol=1e-5, atol=1e-7)
    assert jnp.allclose(jax.block_until_ready(crit_lab(p2, t2)),
                        _mse_reference_jnp(p2, t2, "LAB"), rtol=5e-3, atol=1e-5)

    # 3) Native bf16 inputs (kernel reads bf16, upcasts in-register).
    p3 = jax.random.uniform(k5, (n1, 3), dtype=jnp.float32).astype(jnp.bfloat16)
    t3 = jax.random.uniform(k6, (n1, 3), dtype=jnp.float32).astype(jnp.bfloat16)
    got = jax.block_until_ready(crit_rgb(p3, t3))
    ref = _mse_reference_jnp(p3, t3, "RGB")
    assert jnp.allclose(got, ref, rtol=1e-4, atol=1e-6), (got, ref)

    # 4) Tiny input -> plain-jnp short-circuit.
    p4 = jax.random.uniform(k1, (64, 3), dtype=jnp.float32)
    t4 = jax.random.uniform(k2, (64, 3), dtype=jnp.float32)
    assert jnp.allclose(jax.block_until_ready(crit_rgb(p4, t4)),
                        _mse_reference_jnp(p4, t4, "RGB"))

    print("KERNEL_OK")
</pallas_src>

<mosaic_0001>
module attributes {stable_mosaic.version = 11 : i64} {
  func.func @_mse_rgb_kernel(%arg0: i32, %arg1: i32, %arg2: memref<1024x128xf32, #tpu.memory_space<vmem>>, %arg3: memref<1024x128xf32, #tpu.memory_space<vmem>>, %arg4: memref<1x1xf32, #tpu.memory_space<vmem>>, %arg5: memref<1024x128xf32, #tpu.memory_space<vmem>>) attributes {dimension_semantics = [#tpu.dimension_semantics<parallel>, #tpu.dimension_semantics<arbitrary>], iteration_bounds = array<i64: 1, 1>, scalar_prefetch = 0 : i64, scratch_operands = 1 : i64, tpu.core_type = #tpu.core_type<tc>, window_params = [{transform_indices = @transform_0, window_bounds = array<i64: 1024, 128>}, {transform_indices = @transform_1, window_bounds = array<i64: 1024, 128>}, {transform_indices = @transform_2, window_bounds = array<i64: 1, 1>}]} {
    %c0_i32 = arith.constant 0 : i32
    %0 = arith.cmpi eq, %arg1, %c0_i32 : i32
    %1 = arith.extui %0 : i1 to i32
    %c0_i32_0 = arith.constant 0 : i32
    %2 = arith.cmpi ne, %1, %c0_i32_0 : i32
    scf.if %2 {
      %cst_13 = arith.constant 0.000000e+00 : f32
      %34 = vector.broadcast %cst_13 : f32 to vector<1024x128xf32>
      %c0_14 = arith.constant 0 : index
      %c0_15 = arith.constant 0 : index
      %35 = vector.load %arg5[%c0_14, %c0_15] : memref<1024x128xf32, #tpu.memory_space<vmem>>, vector<1024x128xf32>
      tpu.vector_store %arg5[%c0_14, %c0_15], %34 {strides = array<i32>} : memref<1024x128xf32, #tpu.memory_space<vmem>>, vector<1024x128xf32>,
    } else {
    }
    %c1_i32 = arith.constant 1 : i32
    %3 = arith.muli %arg0, %c1_i32 : i32
    %4 = arith.addi %3, %arg1 : i32
    %c131072_i32 = arith.constant 131072 : i32
    %5 = arith.muli %4, %c131072_i32 : i32
    %6 = tpu.iota {dimensions = array<i32: 0>} : vector<1024x128xi32>
    %c128_i32 = arith.constant 128 : i32
    %7 = vector.broadcast %c128_i32 : i32 to vector<1024x128xi32>
    %8 = arith.muli %6, %7 : vector<1024x128xi32>
    %9 = tpu.iota {dimensions = array<i32: 1>} : vector<1024x128xi32>
    %10 = arith.addi %8, %9 : vector<1024x128xi32>
    %c49152_i32 = arith.constant 49152 : i32
    %11 = arith.subi %c49152_i32, %5 : i32
    %c0_i32_1 = arith.constant 0 : i32
    %c1_i32_2 = arith.constant 1 : i32
    %12 = arith.muli %c0_i32_1, %c1_i32_2 : i32
    %c0_i32_3 = arith.constant 0 : i32
    %13 = arith.addi %c0_i32_3, %12 : i32
    %c1024_i32 = arith.constant 1024 : i32
    %14 = arith.muli %13, %c1024_i32 : i32
    %15 = tpu.assume_multiple %14, 1024 : i32
    %16 = arith.index_cast %15 : i32 to index
    %c0 = arith.constant 0 : index
    %17 = vector.load %arg2[%16, %c0] : memref<1024x128xf32, #tpu.memory_space<vmem>>, vector<1024x128xf32>
    %18 = arith.index_cast %15 : i32 to index
    %c0_4 = arith.constant 0 : index
    %19 = vector.load %arg3[%18, %c0_4] : memref<1024x128xf32, #tpu.memory_space<vmem>>, vector<1024x128xf32>
    %20 = arith.subf %17, %19 : vector<1024x128xf32>
    %c131072_i32_5 = arith.constant 131072 : i32
    %21 = arith.muli %13, %c131072_i32_5 : i32
    %22 = arith.subi %11, %21 : i32
    %c0_6 = arith.constant 0 : index
    %c0_7 = arith.constant 0 : index
    %23 = vector.load %arg5[%c0_6, %c0_7] : memref<1024x128xf32, #tpu.memory_space<vmem>>, vector<1024x128xf32>
    %24 = vector.broadcast %22 : i32 to vector<1024x128xi32>
    %25 = arith.cmpi slt, %10, %24 : vector<1024x128xi32>
    %26 = arith.mulf %20, %20 : vector<1024x128xf32>
    %cst = arith.constant 0.000000e+00 : f32
    %27 = vector.broadcast %cst : f32 to vector<1024x128xf32>
    %28 = arith.select %25, %26, %27 : vector<1024x128xi1>, vector<1024x128xf32>
    %29 = arith.addf %23, %28 : vector<1024x128xf32>
    %c0_8 = arith.constant 0 : index
    %c0_9 = arith.constant 0 : index
    %30 = vector.load %arg5[%c0_8, %c0_9] : memref<1024x128xf32, #tpu.memory_space<vmem>>, vector<1024x128xf32>
    tpu.vector_store %arg5[%c0_8, %c0_9], %29 {strides = array<i32>} : memref<1024x128xf32, #tpu.memory_space<vmem>>, vector<1024x128xf32>,
    %c1_i32_10 = arith.constant 1 : i32
    %c0_i32_11 = arith.constant 0 : i32
    %31 = arith.cmpi eq, %arg1, %c0_i32_11 : i32
    %32 = arith.extui %31 : i1 to i32
    %c0_i32_12 = arith.constant 0 : i32
    %33 = arith.cmpi ne, %32, %c0_i32_12 : i32
    scf.if %33 {
      %c0_13 = arith.constant 0 : index
      %c0_14 = arith.constant 0 : index
      %34 = vector.load %arg5[%c0_13, %c0_14] : memref<1024x128xf32, #tpu.memory_space<vmem>>, vector<1024x128xf32>
      %35 = vector.shape_cast %34 : vector<1024x128xf32> to vector<1x1024x128xf32>
      %cst_15 = arith.constant dense<0.000000e+00> : vector<1xf32>
      %36 = vector.multi_reduction <add>, %35, %cst_15 [1, 2] : vector<1x1024x128xf32> to vector<1xf32>
      %37 = vector.shape_cast %36 : vector<1xf32> to vector<1x1x1xf32>
      %38 = vector.extract %37[0, 0, 0] : f32 from vector<1x1x1xf32>
      %39 = vector.broadcast %38 : f32 to vector<1x1xf32>
      %cst_16 = arith.constant 2.03450527E-5 : f32
      %40 = vector.broadcast %cst_16 : f32 to vector<1x1xf32>
      %41 = arith.mulf %39, %40 : vector<1x1xf32>
      %c0_17 = arith.constant 0 : index
      %c0_18 = arith.constant 0 : index
      %42 = vector.load %arg4[%c0_17, %c0_18] : memref<1x1xf32, #tpu.memory_space<vmem>>, vector<1x1xf32>
      tpu.vector_store %arg4[%c0_17, %c0_18], %41 {strides = array<i32>} : memref<1x1xf32, #tpu.memory_space<vmem>>, vector<1x1xf32>,
    } else {
    }
    return
  }
  func.func @transform_0(%arg0: i32, %arg1: i32) -> (i32, i32) {
    %c1_i32 = arith.constant 1 : i32
    %0 = arith.muli %arg0, %c1_i32 : i32
    %1 = arith.addi %0, %arg1 : i32
    %c0_i32 = arith.constant 0 : i32
    %2 = arith.minsi %1, %c0_i32 : i32
    %c0_i32_0 = arith.constant 0 : i32
    %c0_i32_1 = arith.constant 0 : i32
    return %2, %c0_i32_0 : i32, i32
  }
  func.func @transform_1(%arg0: i32, %arg1: i32) -> (i32, i32) {
    %c1_i32 = arith.constant 1 : i32
    %0 = arith.muli %arg0, %c1_i32 : i32
    %1 = arith.addi %0, %arg1 : i32
    %c0_i32 = arith.constant 0 : i32
    %2 = arith.minsi %1, %c0_i32 : i32
    %c0_i32_0 = arith.constant 0 : i32
    %c0_i32_1 = arith.constant 0 : i32
    return %2, %c0_i32_0 : i32, i32
  }
  func.func @transform_2(%arg0: i32, %arg1: i32) -> (i32, i32) {
    %c0_i32 = arith.constant 0 : i32
    %c0_i32_0 = arith.constant 0 : i32
    return %arg0, %c0_i32 : i32, i32
  }
}

</mosaic_0001>

<bundles_post_ra>
// kernel: _mse_rgb.1
= control target key start
LH: loop header
LB: loop body
LE: loop exit
PB: predicated region body
PF: predicated region fallthrough
CT: control target
= control target key end

     0   :  { %7 = vsyncpa [#allocation4], 0  ;;  %v3911_v0 = vlaneseq  ;;  %s3908_s0 = inlined_call_operand.vmem [shape: f32[384,128], index: 0, kind: input, shape index: {}]   ;;  %s3909_s1 = inlined_call_operand.vmem [shape: f32[384,128], index: 1, kind: input, shape index: {}]   ;;  %s3910_s2 = inlined_call_operand.hbm [shape: f32[1,1], index: 2, kind: output, shape index: {}]  }
   0x1   :  { %s2049_s19 = sshll.u32 %s3910_s2, 4  ;;  %s2050_s19 = int_to_ptr.hbm [resolvable:$true] %s2049_s19 }
   0x2   :  { %v2116_v1 = vshrl.u32 %v3911_v0, 7 }
   0x4   :  { %3966 = vst [vmem:[#allocation6_spill] sm:$0xff] %v2116_v1  ;;  %v2119_v2 = vadd.s32 264, %v2116_v1  ;;  %v2122_v3 = vadd.s32 272, %v2116_v1  ;;  %v2125_v4 = vadd.s32 280, %v2116_v1  ;;  %v2128_v5 = vadd.s32 288, %v2116_v1 }
   0x5   :  { %v2131_v6 = vadd.s32 296, %v2116_v1  ;;  %v2134_v7 = vadd.s32 304, %v2116_v1  ;;  %v2137_v8 = vadd.s32 312, %v2116_v1  ;;  %v2140_v9 = vadd.s32 320, %v2116_v1 }
   0x6   :  { %v2143_v10 = vadd.s32 328, %v2116_v1  ;;  %v2146_v11 = vadd.s32 336, %v2116_v1  ;;  %v2149_v12 = vadd.s32 344, %v2116_v1  ;;  %v2152_v13 = vadd.s32 352, %v2116_v1 }
   0x7   :  { %v2155_v14 = vadd.s32 360, %v2116_v1  ;;  %v2158_v15 = vadd.s32 368, %v2116_v1  ;;  %v2161_v16 = vadd.s32 376, %v2116_v1  ;;  %v2164_v17 = vadd.s32 384, %v2116_v1 }
   0x8   :  { %v2167_v18 = vadd.s32 392, %v2116_v1  ;;  %v2170_v19 = vadd.s32 400, %v2116_v1  ;;  %v2173_v20 = vadd.s32 408, %v2116_v1  ;;  %v2176_v21 = vadd.s32 416, %v2116_v1 }
   0x9   :  { %v2179_v22 = vadd.s32 424, %v2116_v1  ;;  %v2182_v23 = vadd.s32 432, %v2116_v1  ;;  %v2185_v24 = vadd.s32 440, %v2116_v1  ;;  %v2188_v25 = vadd.s32 448, %v2116_v1 }
   0xa   :  { %v2191_v26 = vadd.s32 456, %v2116_v1  ;;  %v2194_v27 = vadd.s32 464, %v2116_v1  ;;  %v2197_v28 = vadd.s32 472, %v2116_v1  ;;  %v2200_v29 = vadd.s32 480, %v2116_v1 }
   0xb   :  { %v2203_v30 = vadd.s32 488, %v2116_v1  ;;  %v2206_v31 = vadd.s32 496, %v2116_v1  ;;  %v2209_v32 = vadd.s32 504, %v2116_v1  ;;  %v2212_v33 = vadd.s32 512, %v2116_v1 }
   0xc   :  { %v2215_v34 = vadd.s32 520, %v2116_v1  ;;  %v2218_v35 = vadd.s32 528, %v2116_v1  ;;  %v2221_v36 = vadd.s32 536, %v2116_v1  ;;  %v2224_v37 = vadd.s32 544, %v2116_v1 }
   0xd   :  { %v2227_v38 = vadd.s32 552, %v2116_v1  ;;  %v2230_v39 = vadd.s32 560, %v2116_v1  ;;  %v2233_v40 = vadd.s32 568, %v2116_v1  ;;  %v2236_v41 = vadd.s32 576, %v2116_v1 }
   0xe   :  { %v2239_v42 = vadd.s32 584, %v2116_v1  ;;  %v2242_v43 = vadd.s32 592, %v2116_v1  ;;  %v2245_v44 = vadd.s32 600, %v2116_v1  ;;  %v2248_v45 = vadd.s32 608, %v2116_v1 }
   0xf   :  { %v2251_v46 = vadd.s32 616, %v2116_v1  ;;  %v2254_v47 = vadd.s32 624, %v2116_v1  ;;  %v2257_v48 = vadd.s32 632, %v2116_v1  ;;  %v2260_v49 = vadd.s32 640, %v2116_v1 }
  0x10   :  { %3967 = vst [vmem:[#allocation7_spill] sm:$0xff] %v2245_v44  ;;  %v2263_v50 = vadd.s32 648, %v2116_v1  ;;  %v2266_v51 = vadd.s32 656, %v2116_v1  ;;  %v2269_v52 = vadd.s32 664, %v2116_v1  ;;  %v2272_v53 = vadd.s32 672, %v2116_v1 }
  0x11   :  { %3968 = vst [vmem:[#allocation8_spill] sm:$0xff] %v2248_v45  ;;  %v2275_v54 = vadd.s32 680, %v2116_v1  ;;  %v2278_v55 = vadd.s32 688, %v2116_v1  ;;  %v2281_v56 = vadd.s32 696, %v2116_v1  ;;  %v2284_v57 = vadd.s32 704, %v2116_v1 }
  0x12   :  { %3969 = vst [vmem:[#allocation9_spill] sm:$0xff] %v2251_v46  ;;  %v2287_v58 = vadd.s32 712, %v2116_v1  ;;  %v2290_v59 = vadd.s32 720, %v2116_v1  ;;  %v2293_v60 = vadd.s32 728, %v2116_v1  ;;  %v2296_v61 = vadd.s32 736, %v2116_v1 }
  0x13   :  { %3970 = vst [vmem:[#allocation10_spill] sm:$0xff] %v2254_v47  ;;  %v2299_v62 = vadd.s32 744, %v2116_v1  ;;  %v2302_v63 = vadd.s32 752, %v2116_v1  ;;  %v2305_v0 = vadd.s32 760, %v2116_v1 }
  0x14   :  { %3971 = vst [vmem:[#allocation11_spill] sm:$0xff] %v2257_v48  ;;  %v4056_v48 = vlaneseq }
  0x15   :  { %3972 = vst [vmem:[#allocation12_spill] sm:$0xff] %v2260_v49 }
  0x16   :  { %3973 = vst [vmem:[#allocation13_spill] sm:$0xff] %v2263_v50  ;;  %v4063_v50 = vmul.u32 128, %v2125_v4  ;;  %v4067_v4 = vmul.u32 128, %v2137_v8  ;;  %v4071_v8 = vmul.u32 128, %v2149_v12  ;;  %v4075_v12 = vmul.u32 128, %v2161_v16 }
  0x17   :  { %3974 = vst [vmem:[#allocation14_spill] sm:$0xff] %v2266_v51  ;;  %v4079_v16 = vmul.u32 128, %v2173_v20  ;;  %v4083_v20 = vmul.u32 128, %v2185_v24  ;;  %v4087_v24 = vmul.u32 128, %v2197_v28  ;;  %v4091_v28 = vmul.u32 128, %v2209_v32 }
  0x18   :  { %3975 = vst [vmem:[#allocation15_spill] sm:$0xff] %v2269_v52  ;;  %v4064_v52 = vmul.u32 128, %v2128_v5  ;;  %v4068_v5 = vmul.u32 128, %v2140_v9  ;;  %v4072_v9 = vmul.u32 128, %v2152_v13  ;;  %v4076_v13 = vmul.u32 128, %v2164_v17 }
  0x19   :  { %3976 = vst [vmem:[#allocation16_spill] sm:$0xff] %v2272_v53  ;;  %v4080_v17 = vmul.u32 128, %v2176_v21  ;;  %v4084_v21 = vmul.u32 128, %v2188_v25  ;;  %v4088_v25 = vmul.u32 128, %v2200_v29  ;;  %v4092_v29 = vmul.u32 128, %v2212_v33 }
  0x1a   :  { %3977 = vst [vmem:[#allocation17_spill] sm:$0xff] %v2275_v54  ;;  %v4095_v32 = vmul.u32 128, %v2221_v36  ;;  %v4097_v33 = vmul.u32 128, %v2224_v37  ;;  %v4103_v36 = vmul.u32 128, %v2233_v40  ;;  %v4105_v37 = vmul.u32 128, %v2236_v41 }
  0x1b   :  { %3978 = vst [vmem:[#allocation18_spill] sm:$0xff] %v2278_v55 }
  0x1c   :  { %3979 = vst [vmem:[#allocation19_spill] sm:$0xff] %v2281_v56 }
  0x1d   :  { %3980 = vst [vmem:[#allocation20_spill] sm:$0xff] %v2284_v57 }
  0x1e   :  { %3981 = vst [vmem:[#allocation21_spill] sm:$0xff] %v2287_v58  ;;  %v2308_v58 = vadd.s32 768, %v2116_v1 }
  0x1f   :  { %3982 = vst [vmem:[#allocation22_spill] sm:$0xff] %v2290_v59  ;;  %v2311_v59 = vadd.s32 776, %v2116_v1 }
  0x20   :  { %3983 = vst [vmem:[#allocation23_spill] sm:$0xff] %v2293_v60  ;;  %v2314_v60 = vadd.s32 784, %v2116_v1 }
  0x21   :  { %3984 = vst [vmem:[#allocation24_spill] sm:$0xff] %v2296_v61  ;;  %v2317_v61 = vadd.s32 792, %v2116_v1 }
  0x22   :  { %3985 = vst [vmem:[#allocation25_spill] sm:$0xff] %v2299_v62  ;;  %v2320_v62 = vadd.s32 800, %v2116_v1 }
  0x23   :  { %3986 = vst [vmem:[#allocation26_spill] sm:$0xff] %v2302_v63  ;;  %v2323_v63 = vadd.s32 808, %v2116_v1 }
  0x24   :  { %3987 = vst [vmem:[#allocation27_spill] sm:$0xff] %v2305_v0  ;;  %v2326_v0 = vadd.s32 816, %v2116_v1 }
  0x25   :  { %3988 = vst [vmem:[#allocation28_spill] sm:$0xff] %v2308_v58  ;;  %v2329_v58 = vadd.s32 824, %v2116_v1 }
  0x26   :  { %3989 = vst [vmem:[#allocation29_spill] sm:$0xff] %v2311_v59  ;;  %v2332_v59 = vadd.s32 832, %v2116_v1 }
  0x27   :  { %3990 = vst [vmem:[#allocation30_spill] sm:$0xff] %v2314_v60  ;;  %v2335_v60 = vadd.s32 840, %v2116_v1 }
  0x28   :  { %3991 = vst [vmem:[#allocation31_spill] sm:$0xff] %v2317_v61  ;;  %v2338_v61 = vadd.s32 848, %v2116_v1 }
  0x29   :  { %3992 = vst [vmem:[#allocation32_spill] sm:$0xff] %v2320_v62  ;;  %v2341_v62 = vadd.s32 856, %v2116_v1 }
  0x2a   :  { %3993 = vst [vmem:[#allocation33_spill] sm:$0xff] %v2323_v63  ;;  %v2344_v63 = vadd.s32 864, %v2116_v1 }
  0x2b   :  { %3994 = vst [vmem:[#allocation34_spill] sm:$0xff] %v2326_v0  ;;  %v2347_v0 = vadd.s32 872, %v2116_v1 }
  0x2c   :  { %3995 = vst [vmem:[#allocation35_spill] sm:$0xff] %v2329_v58  ;;  %v2350_v58 = vadd.s32 880, %v2116_v1 }
  0x2d   :  { %3996 = vst [vmem:[#allocation36_spill] sm:$0xff] %v2332_v59  ;;  %v2353_v59 = vadd.s32 888, %v2116_v1 }
  0x2e   :  { %3997 = vst [vmem:[#allocation37_spill] sm:$0xff] %v2335_v60  ;;  %v2356_v60 = vadd.s32 896, %v2116_v1 }
  0x2f   :  { %3998 = vst [vmem:[#allocation38_spill] sm:$0xff] %v2338_v61  ;;  %v2359_v61 = vadd.s32 904, %v2116_v1 }
  0x30   :  { %3999 = vst [vmem:[#allocation39_spill] sm:$0xff] %v2341_v62  ;;  %v2362_v62 = vadd.s32 912, %v2116_v1 }
  0x31   :  { %4000 = vst [vmem:[#allocation40_spill] sm:$0xff] %v2344_v63  ;;  %v2365_v63 = vadd.s32 920, %v2116_v1 }
  0x32   :  { %4001 = vst [vmem:[#allocation41_spill] sm:$0xff] %v2347_v0  ;;  %v2368_v0 = vadd.s32 928, %v2116_v1 }
  0x33   :  { %4002 = vst [vmem:[#allocation42_spill] sm:$0xff] %v2350_v58  ;;  %v2371_v58 = vadd.s32 936, %v2116_v1 }
  0x34   :  { %4003 = vst [vmem:[#allocation43_spill] sm:$0xff] %v2353_v59  ;;  %v2374_v59 = vadd.s32 944, %v2116_v1 }
  0x35   :  { %4004 = vst [vmem:[#allocation44_spill] sm:$0xff] %v2356_v60  ;;  %v2377_v60 = vadd.s32 952, %v2116_v1 }
  0x36   :  { %4005 = vst [vmem:[#allocation45_spill] sm:$0xff] %v2359_v61  ;;  %v2380_v61 = vadd.s32 960, %v2116_v1 }
  0x37   :  { %4006 = vst [vmem:[#allocation46_spill] sm:$0xff] %v2362_v62  ;;  %v2383_v62 = vadd.s32 968, %v2116_v1 }
  0x38   :  { %4007 = vst [vmem:[#allocation47_spill] sm:$0xff] %v2365_v63  ;;  %v2386_v63 = vadd.s32 976, %v2116_v1 }
  0x39   :  { %4008 = vst [vmem:[#allocation48_spill] sm:$0xff] %v2368_v0  ;;  %v2389_v0 = vadd.s32 984, %v2116_v1  ;;  %v4054_v46 = vmov %v2383_v62 }
  0x3a   :  { %4009 = vst [vmem:[#allocation49_spill] sm:$0xff] %v2371_v58  ;;  %v2392_v58 = vadd.s32 992, %v2116_v1  ;;  %v4055_v47 = vmov %v2386_v63 }
  0x3b   :  { %4010 = vst [vmem:[#allocation50_spill] sm:$0xff] %v2374_v59  ;;  %v2395_v59 = vadd.s32 1000, %v2116_v1  ;;  %v4057_v57 = vmov %v2389_v0 }
  0x3c   :  { %4011 = vst [vmem:[#allocation51_spill] sm:$0xff] %v2377_v60  ;;  %v2398_v60 = vadd.s32 1008, %v2116_v1 }
  0x3d   :  { %4012 = vst [vmem:[#allocation52_spill] sm:$0xff] %v2380_v61  ;;  %v2401_v61 = vadd.s32 1016, %v2116_v1  ;;  %v4046_v49 = vld [vmem:[#allocation45_spill] sm:$0xff]  ;;  %v4062_v1 = vmul.u32 128, %v2122_v3  ;;  %v4066_v3 = vmul.u32 128, %v2134_v7  ;;  %v4070_v7 = vmul.u32 128, %v2146_v11 }
  0x3e   :  { %4013 = vst [vmem:[#allocation53_spill] sm:$0xff] %v2383_v62  ;;  %v2494_v62 = vand.u32 127, %v4056_v48  ;;  %v4060_v56 = vmov %v2398_v60  ;;  %v4074_v11 = vmul.u32 128, %v2158_v15  ;;  %v4078_v15 = vmul.u32 128, %v2170_v19 }
  0x3f   :  { %4014 = vst [vmem:[#allocation54_spill] sm:$0xff] %v2386_v63  ;;  %v4058_v63 = vmov %v2392_v58  ;;  %v4082_v19 = vmul.u32 128, %v2182_v23  ;;  %v4086_v23 = vmul.u32 128, %v2194_v27  ;;  %v4090_v27 = vmul.u32 128, %v2206_v31 }
  0x40   :  { %4015 = vst [vmem:[#allocation55_spill] sm:$0xff] %v2389_v0  ;;  %v4059_v0 = vmov %v2395_v59  ;;  %v2509_v48 = vadd.s32 %v2494_v62, %v4062_v1  ;;  %v2514_v51 = vadd.s32 %v2494_v62, %v4063_v50  ;;  %v2519_v53 = vadd.s32 %v2494_v62, %v4064_v52 }
  0x41   :  { %4016 = vst [vmem:[#allocation56_spill] sm:$0xff] %v2392_v58  ;;  %v2529_v1 = vadd.s32 %v2494_v62, %v4066_v3  ;;  %v2534_v50 = vadd.s32 %v2494_v62, %v4067_v4  ;;  %v2539_v52 = vadd.s32 %v2494_v62, %v4068_v5  ;;  %v2549_v3 = vadd.s32 %v2494_v62, %v4070_v7  ;;  %v4111_v58 = vld [vmem:[#allocation7_spill] sm:$0xff] }
  0x42   :  { %4017 = vst [vmem:[#allocation57_spill] sm:$0xff] %v2395_v59  ;;  %v4051_v54 = vld [vmem:[#allocation50_spill] sm:$0xff]  ;;  %v4061_v59 = vmul.u32 128, %v2119_v2  ;;  %v4065_v2 = vmul.u32 128, %v2131_v6  ;;  %v4069_v6 = vmul.u32 128, %v2143_v10  ;;  %v2554_v4 = vadd.s32 %v2494_v62, %v4071_v8 }
  0x43   :  { %4018 = vst [vmem:[#allocation58_spill] sm:$0xff] %v2398_v60  ;;  %v4052_v44 = vld [vmem:[#allocation51_spill] sm:$0xff]  ;;  %v2559_v5 = vadd.s32 %v2494_v62, %v4072_v9  ;;  %v4073_v10 = vmul.u32 128, %v2155_v14  ;;  %v2569_v7 = vadd.s32 %v2494_v62, %v4074_v11  ;;  %v2574_v8 = vadd.s32 %v2494_v62, %v4075_v12  ;;  %v4114_v60 = vld [vmem:[#allocation8_spill] sm:$0xff] }
  0x44   :  { %v4053_v45 = vld [vmem:[#allocation52_spill] sm:$0xff]  ;;  %v2504_v55 = vadd.s32 %v2494_v62, %v4061_v59  ;;  %v2524_v59 = vadd.s32 %v2494_v62, %v4065_v2  ;;  %v2544_v2 = vadd.s32 %v2494_v62, %v4069_v6  ;;  %v2579_v9 = vadd.s32 %v2494_v62, %v4076_v13 }
  0x45   :  { %v2564_v6 = vadd.s32 %v2494_v62, %v4073_v10  ;;  %v4077_v14 = vmul.u32 128, %v2167_v18  ;;  %v2589_v11 = vadd.s32 %v2494_v62, %v4078_v15  ;;  %v2594_v12 = vadd.s32 %v2494_v62, %v4079_v16 }
  0x46   :  { %v2599_v13 = vadd.s32 %v2494_v62, %v4080_v17  ;;  %v4081_v18 = vmul.u32 128, %v2179_v22  ;;  %v2609_v15 = vadd.s32 %v2494_v62, %v4082_v19  ;;  %v2614_v16 = vadd.s32 %v2494_v62, %v4083_v20 }
  0x47   :  { %v2584_v10 = vadd.s32 %v2494_v62, %v4077_v14  ;;  %v2619_v17 = vadd.s32 %v2494_v62, %v4084_v21  ;;  %v4085_v22 = vmul.u32 128, %v2191_v26  ;;  %v2629_v19 = vadd.s32 %v2494_v62, %v4086_v23 }
  0x48   :  { %v2604_v14 = vadd.s32 %v2494_v62, %v4081_v18  ;;  %v2634_v20 = vadd.s32 %v2494_v62, %v4087_v24  ;;  %v2639_v21 = vadd.s32 %v2494_v62, %v4088_v25  ;;  %v4089_v26 = vmul.u32 128, %v2203_v30 }
  0x49   :  { %v2624_v18 = vadd.s32 %v2494_v62, %v4085_v22  ;;  %v2649_v23 = vadd.s32 %v2494_v62, %v4090_v27  ;;  %v2654_v24 = vadd.s32 %v2494_v62, %v4091_v28  ;;  %v2659_v25 = vadd.s32 %v2494_v62, %v4092_v29 }
  0x4a   :  { %v2644_v22 = vadd.s32 %v2494_v62, %v4089_v26  ;;  %v4093_v30 = vmul.u32 128, %v2215_v34  ;;  %v4094_v31 = vmul.u32 128, %v2218_v35  ;;  %v2674_v28 = vadd.s32 %v2494_v62, %v4095_v32 }
  0x4b   :  { %v2679_v29 = vadd.s32 %v2494_v62, %v4097_v33  ;;  %v4099_v34 = vmul.u32 128, %v2227_v38  ;;  %v4101_v35 = vmul.u32 128, %v2230_v39  ;;  %v2694_v32 = vadd.s32 %v2494_v62, %v4103_v36 }
  0x4c   :  { %v2664_v26 = vadd.s32 %v2494_v62, %v4093_v30  ;;  %v2669_v27 = vadd.s32 %v2494_v62, %v4094_v31  ;;  %4096 = vst [vmem:[#allocation45_spill] sm:$0xff] %v2674_v28  ;;  %v2699_v33 = vadd.s32 %v2494_v62, %v4105_v37  ;;  %v4107_v38 = vmul.u32 128, %v2239_v42 }
  0x4d   :  { %4098 = vst [vmem:[#allocation50_spill] sm:$0xff] %v2679_v29  ;;  %v2684_v30 = vadd.s32 %v2494_v62, %v4099_v34  ;;  %v2689_v31 = vadd.s32 %v2494_v62, %v4101_v35  ;;  %v4109_v39 = vmul.u32 128, %v2242_v43  ;;  %v4112_v40 = vmul.u32 128, %v4111_v58 }
  0x4e   :  { %4104 = vst [vmem:[#allocation53_spill] sm:$0xff] %v2694_v32  ;;  %v2704_v34 = vadd.s32 %v2494_v62, %v4107_v38  ;;  %v4115_v41 = vmul.u32 128, %v4114_v60 }
  0x4f   :  { %4100 = vst [vmem:[#allocation51_spill] sm:$0xff] %v2684_v30  ;;  %v2709_v35 = vadd.s32 %v2494_v62, %v4109_v39  ;;  %v2714_v36 = vadd.s32 %v2494_v62, %v4112_v40 }
  0x50   :  { %4102 = vst [vmem:[#allocation52_spill] sm:$0xff] %v2689_v31  ;;  %v2719_v37 = vadd.s32 %v2494_v62, %v4115_v41 }
  0x51   :  { %4106 = vst [vmem:[#allocation54_spill] sm:$0xff] %v2699_v33  ;;  %v4117_v33 = vld [vmem:[#allocation9_spill] sm:$0xff] }
  0x52   :  { %4108 = vst [vmem:[#allocation55_spill] sm:$0xff] %v2704_v34  ;;  %v4118_v42 = vmul.u32 128, %v4117_v33  ;;  %v4120_v34 = vld [vmem:[#allocation10_spill] sm:$0xff] }
  0x53   :  { %4110 = vst [vmem:[#allocation56_spill] sm:$0xff] %v2709_v35  ;;  %v4121_v43 = vmul.u32 128, %v4120_v34  ;;  %v4123_v35 = vld [vmem:[#allocation11_spill] sm:$0xff] }
  0x54   :  { %4113 = vst [vmem:[#allocation57_spill] sm:$0xff] %v2714_v36  ;;  %v2724_v38 = vadd.s32 %v2494_v62, %v4118_v42  ;;  %v4124_v58 = vmul.u32 128, %v4123_v35  ;;  %v4126_v36 = vld [vmem:[#allocation12_spill] sm:$0xff] }
  0x55   :  { %4116 = vst [vmem:[#allocation58_spill] sm:$0xff] %v2719_v37  ;;  %v2729_v39 = vadd.s32 %v2494_v62, %v4121_v43  ;;  %v4127_v60 = vmul.u32 128, %v4126_v36  ;;  %v4129_v37 = vld [vmem:[#allocation13_spill] sm:$0xff] }
  0x56   :  { %4119 = vst [vmem:[#allocation7_spill] sm:$0xff] %v2724_v38  ;;  %v2734_v40 = vadd.s32 %v2494_v62, %v4124_v58  ;;  %v4130_v33 = vmul.u32 128, %v4129_v37  ;;  %v4132_v38 = vld [vmem:[#allocation14_spill] sm:$0xff] }
  0x57   :  { %4122 = vst [vmem:[#allocation8_spill] sm:$0xff] %v2729_v39  ;;  %v2739_v41 = vadd.s32 %v2494_v62, %v4127_v60  ;;  %v4133_v34 = vmul.u32 128, %v4132_v38  ;;  %v4135_v39 = vld [vmem:[#allocation15_spill] sm:$0xff] }
  0x58   :  { %4125 = vst [vmem:[#allocation9_spill] sm:$0xff] %v2734_v40  ;;  %v2744_v42 = vadd.s32 %v2494_v62, %v4130_v33  ;;  %v4136_v35 = vmul.u32 128, %v4135_v39  ;;  %v4138_v40 = vld [vmem:[#allocation16_spill] sm:$0xff] }
  0x59   :  { %4128 = vst [vmem:[#allocation10_spill] sm:$0xff] %v2739_v41  ;;  %v2749_v43 = vadd.s32 %v2494_v62, %v4133_v34  ;;  %v4139_v36 = vmul.u32 128, %v4138_v40  ;;  %v4141_v41 = vld [vmem:[#allocation17_spill] sm:$0xff] }
  0x5a   :  { %4131 = vst [vmem:[#allocation11_spill] sm:$0xff] %v2744_v42  ;;  %v2754_v58 = vadd.s32 %v2494_v62, %v4136_v35  ;;  %v4142_v37 = vmul.u32 128, %v4141_v41  ;;  %v4144_v42 = vld [vmem:[#allocation18_spill] sm:$0xff] }
  0x5b   :  { %4134 = vst [vmem:[#allocation12_spill] sm:$0xff] %v2749_v43  ;;  %v2759_v60 = vadd.s32 %v2494_v62, %v4139_v36  ;;  %v4145_v38 = vmul.u32 128, %v4144_v42  ;;  %v4147_v43 = vld [vmem:[#allocation19_spill] sm:$0xff] }
  0x5c   :  { %4137 = vst [vmem:[#allocation13_spill] sm:$0xff] %v2754_v58  ;;  %v2764_v33 = vadd.s32 %v2494_v62, %v4142_v37  ;;  %v4148_v39 = vmul.u32 128, %v4147_v43  ;;  %v4150_v58 = vld [vmem:[#allocation20_spill] sm:$0xff] }
  0x5d   :  { %4140 = vst [vmem:[#allocation14_spill] sm:$0xff] %v2759_v60  ;;  %v2769_v34 = vadd.s32 %v2494_v62, %v4145_v38  ;;  %v4151_v40 = vmul.u32 128, %v4150_v58  ;;  %v4153_v60 = vld [vmem:[#allocation21_spill] sm:$0xff] }
  0x5e   :  { %4143 = vst [vmem:[#allocation15_spill] sm:$0xff] %v2764_v33  ;;  %v2774_v35 = vadd.s32 %v2494_v62, %v4148_v39  ;;  %v4154_v41 = vmul.u32 128, %v4153_v60  ;;  %v4156_v33 = vld [vmem:[#allocation22_spill] sm:$0xff] }
  0x5f   :  { %4146 = vst [vmem:[#allocation16_spill] sm:$0xff] %v2769_v34  ;;  %v2779_v36 = vadd.s32 %v2494_v62, %v4151_v40  ;;  %v4157_v42 = vmul.u32 128, %v4156_v33  ;;  %v4159_v34 = vld [vmem:[#allocation23_spill] sm:$0xff] }
  0x60   :  { %4149 = vst [vmem:[#allocation17_spill] sm:$0xff] %v2774_v35  ;;  %v2784_v37 = vadd.s32 %v2494_v62, %v4154_v41  ;;  %v4160_v43 = vmul.u32 128, %v4159_v34  ;;  %v4162_v35 = vld [vmem:[#allocation24_spill] sm:$0xff] }
  0x61   :  { %4152 = vst [vmem:[#allocation18_spill] sm:$0xff] %v2779_v36  ;;  %v2789_v38 = vadd.s32 %v2494_v62, %v4157_v42  ;;  %v4163_v58 = vmul.u32 128, %v4162_v35  ;;  %v4165_v36 = vld [vmem:[#allocation25_spill] sm:$0xff] }
  0x62   :  { %4155 = vst [vmem:[#allocation19_spill] sm:$0xff] %v2784_v37  ;;  %v2794_v39 = vadd.s32 %v2494_v62, %v4160_v43  ;;  %v4166_v60 = vmul.u32 128, %v4165_v36  ;;  %v4168_v37 = vld [vmem:[#allocation26_spill] sm:$0xff] }
  0x63   :  { %4158 = vst [vmem:[#allocation20_spill] sm:$0xff] %v2789_v38  ;;  %v2799_v40 = vadd.s32 %v2494_v62, %v4163_v58  ;;  %v4169_v33 = vmul.u32 128, %v4168_v37  ;;  %v4171_v38 = vld [vmem:[#allocation27_spill] sm:$0xff] }
  0x64   :  { %4161 = vst [vmem:[#allocation21_spill] sm:$0xff] %v2794_v39  ;;  %v2804_v41 = vadd.s32 %v2494_v62, %v4166_v60  ;;  %v4172_v34 = vmul.u32 128, %v4171_v38  ;;  %v4174_v39 = vld [vmem:[#allocation28_spill] sm:$0xff] }
  0x65   :  { %4164 = vst [vmem:[#allocation22_spill] sm:$0xff] %v2799_v40  ;;  %v2809_v42 = vadd.s32 %v2494_v62, %v4169_v33  ;;  %v4175_v35 = vmul.u32 128, %v4174_v39  ;;  %v4177_v40 = vld [vmem:[#allocation29_spill] sm:$0xff] }
  0x66   :  { %4167 = vst [vmem:[#allocation23_spill] sm:$0xff] %v2804_v41  ;;  %v2814_v43 = vadd.s32 %v2494_v62, %v4172_v34  ;;  %v4178_v36 = vmul.u32 128, %v4177_v40  ;;  %v4180_v41 = vld [vmem:[#allocation30_spill] sm:$0xff] }
  0x67   :  { %4170 = vst [vmem:[#allocation24_spill] sm:$0xff] %v2809_v42  ;;  %v2819_v58 = vadd.s32 %v2494_v62, %v4175_v35  ;;  %v4181_v37 = vmul.u32 128, %v4180_v41  ;;  %v4183_v42 = vld [vmem:[#allocation31_spill] sm:$0xff] }
  0x68   :  { %4173 = vst [vmem:[#allocation25_spill] sm:$0xff] %v2814_v43  ;;  %v2824_v60 = vadd.s32 %v2494_v62, %v4178_v36  ;;  %v4184_v38 = vmul.u32 128, %v4183_v42  ;;  %v4186_v43 = vld [vmem:[#allocation32_spill] sm:$0xff] }
  0x69   :  { %4176 = vst [vmem:[#allocation26_spill] sm:$0xff] %v2819_v58  ;;  %v2829_v33 = vadd.s32 %v2494_v62, %v4181_v37  ;;  %v4187_v39 = vmul.u32 128, %v4186_v43  ;;  %v4189_v58 = vld [vmem:[#allocation33_spill] sm:$0xff] }
  0x6a   :  { %4179 = vst [vmem:[#allocation27_spill] sm:$0xff] %v2824_v60  ;;  %v2834_v34 = vadd.s32 %v2494_v62, %v4184_v38  ;;  %v4190_v40 = vmul.u32 128, %v4189_v58  ;;  %v4192_v60 = vld [vmem:[#allocation34_spill] sm:$0xff] }
  0x6b   :  { %4182 = vst [vmem:[#allocation28_spill] sm:$0xff] %v2829_v33  ;;  %v2839_v35 = vadd.s32 %v2494_v62, %v4187_v39  ;;  %v4193_v41 = vmul.u32 128, %v4192_v60  ;;  %v4195_v33 = vld [vmem:[#allocation35_spill] sm:$0xff] }
  0x6c   :  { %4185 = vst [vmem:[#allocation29_spill] sm:$0xff] %v2834_v34  ;;  %v2844_v36 = vadd.s32 %v2494_v62, %v4190_v40  ;;  %v4196_v42 = vmul.u32 128, %v4195_v33  ;;  %v4198_v34 = vld [vmem:[#allocation36_spill] sm:$0xff] }
  0x6d   :  { %4188 = vst [vmem:[#allocation30_spill] sm:$0xff] %v2839_v35  ;;  %v2849_v37 = vadd.s32 %v2494_v62, %v4193_v41  ;;  %v4199_v43 = vmul.u32 128, %v4198_v34  ;;  %v4201_v35 = vld [vmem:[#allocation37_spill] sm:$0xff] }
  0x6e   :  { %4191 = vst [vmem:[#allocation31_spill] sm:$0xff] %v2844_v36  ;;  %v2854_v38 = vadd.s32 %v2494_v62, %v4196_v42  ;;  %v4202_v58 = vmul.u32 128, %v4201_v35  ;;  %v4204_v36 = vld [vmem:[#allocation38_spill] sm:$0xff] }
  0x6f   :  { %4194 = vst [vmem:[#allocation32_spill] sm:$0xff] %v2849_v37  ;;  %v2859_v39 = vadd.s32 %v2494_v62, %v4199_v43  ;;  %v4205_v60 = vmul.u32 128, %v4204_v36  ;;  %v4207_v37 = vld [vmem:[#allocation39_spill] sm:$0xff] }
  0x70   :  { %4197 = vst [vmem:[#allocation33_spill] sm:$0xff] %v2854_v38  ;;  %v2864_v40 = vadd.s32 %v2494_v62, %v4202_v58  ;;  %v4208_v33 = vmul.u32 128, %v4207_v37  ;;  %v4210_v38 = vld [vmem:[#allocation40_spill] sm:$0xff] }
  0x71   :  { %4200 = vst [vmem:[#allocation34_spill] sm:$0xff] %v2859_v39  ;;  %v2869_v41 = vadd.s32 %v2494_v62, %v4205_v60  ;;  %v4211_v34 = vmul.u32 128, %v4210_v38  ;;  %v4213_v39 = vld [vmem:[#allocation41_spill] sm:$0xff] }
  0x72   :  { %4203 = vst [vmem:[#allocation35_spill] sm:$0xff] %v2864_v40  ;;  %v2874_v42 = vadd.s32 %v2494_v62, %v4208_v33  ;;  %v4214_v35 = vmul.u32 128, %v4213_v39  ;;  %v4216_v40 = vld [vmem:[#allocation42_spill] sm:$0xff]  ;;  %v4225_v39 = vmul.u32 128, %v4046_v49 }
  0x73   :  { %4206 = vst [vmem:[#allocation36_spill] sm:$0xff] %v2869_v41  ;;  %v2879_v43 = vadd.s32 %v2494_v62, %v4211_v34  ;;  %v4217_v36 = vmul.u32 128, %v4216_v40  ;;  %v4219_v41 = vld [vmem:[#allocation43_spill] sm:$0xff] }
  0x74   :  { %4209 = vst [vmem:[#allocation37_spill] sm:$0xff] %v2874_v42  ;;  %v2884_v58 = vadd.s32 %v2494_v62, %v4214_v35  ;;  %v4220_v37 = vmul.u32 128, %v4219_v41  ;;  %v4222_v42 = vld [vmem:[#allocation44_spill] sm:$0xff]  ;;  %v2904_v35 = vadd.s32 %v2494_v62, %v4225_v39 }
  0x75   :  { %4212 = vst [vmem:[#allocation38_spill] sm:$0xff] %v2879_v43  ;;  %v2889_v60 = vadd.s32 %v2494_v62, %v4217_v36  ;;  %v4223_v38 = vmul.u32 128, %v4222_v42 }
  0x76   :  { %4215 = vst [vmem:[#allocation39_spill] sm:$0xff] %v2884_v58  ;;  %v2894_v33 = vadd.s32 %v2494_v62, %v4220_v37  ;;  %v4227_v58 = vld [vmem:[#allocation46_spill] sm:$0xff] }
  0x77   :  { %4218 = vst [vmem:[#allocation40_spill] sm:$0xff] %v2889_v60  ;;  %v2899_v34 = vadd.s32 %v2494_v62, %v4223_v38  ;;  %v4228_v40 = vmul.u32 128, %v4227_v58  ;;  %v4230_v60 = vld [vmem:[#allocation47_spill] sm:$0xff]  ;;  %v4239_v58 = vmul.u32 128, %v4051_v54  ;;  %v4247_v54 = vmul.u32 128, %v4055_v47 }
  0x78   :  { %4221 = vst [vmem:[#allocation41_spill] sm:$0xff] %v2894_v33  ;;  %v4231_v41 = vmul.u32 128, %v4230_v60  ;;  %v4233_v33 = vld [vmem:[#allocation48_spill] sm:$0xff]  ;;  %v4241_v60 = vmul.u32 128, %v4052_v44  ;;  %v4249_v44 = vmul.u32 128, %v4057_v57  ;;  %v4255_v47 = vmul.u32 128, %v4060_v56 }
  0x79   :  { %4224 = vst [vmem:[#allocation42_spill] sm:$0xff] %v2899_v34  ;;  %v2909_v36 = vadd.s32 %v2494_v62, %v4228_v40  ;;  %v4234_v42 = vmul.u32 128, %v4233_v33  ;;  %v4236_v34 = vld [vmem:[#allocation49_spill] sm:$0xff]  ;;  %v2929_v40 = vadd.s32 %v2494_v62, %v4239_v58  ;;  %v4243_v33 = vmul.u32 128, %v4053_v45 }
  0x7a   :  { %4226 = vst [vmem:[#allocation43_spill] sm:$0xff] %v2904_v35  ;;  %v2914_v37 = vadd.s32 %v2494_v62, %v4231_v41  ;;  %v4237_v49 = vmul.u32 128, %v4236_v34  ;;  %v2934_v41 = vadd.s32 %v2494_v62, %v4241_v60  ;;  %v4245_v34 = vmul.u32 128, %v4054_v46 }
  0x7b   :  { %4229 = vst [vmem:[#allocation44_spill] sm:$0xff] %v2909_v36  ;;  %v2919_v38 = vadd.s32 %v2494_v62, %v4234_v42  ;;  %v2939_v42 = vadd.s32 %v2494_v62, %v4243_v33  ;;  %v2949_v58 = vadd.s32 %v2494_v62, %v4247_v54  ;;  %v2954_v60 = vadd.s32 %v2494_v62, %v4249_v44 }
  0x7c   :  { %4232 = vst [vmem:[#allocation46_spill] sm:$0xff] %v2914_v37  ;;  %v2924_v39 = vadd.s32 %v2494_v62, %v4237_v49  ;;  %v2944_v49 = vadd.s32 %v2494_v62, %v4245_v34  ;;  %v4251_v45 = vmul.u32 128, %v4058_v63  ;;  %v4253_v46 = vmul.u32 128, %v4059_v0  ;;  %v618_v0 = vld [vmem:[%s3908_s0] sm:$0xff] }
  0x7d   :  { %4235 = vst [vmem:[#allocation47_spill] sm:$0xff] %v2919_v38  ;;  %v2969_v54 = vadd.s32 %v2494_v62, %v4255_v47  ;;  %v4257_v57 = vmul.u32 128, %v2401_v61  ;;  %v619_v61 = vld [vmem:[%s3908_s0 + $0x8] sm:$0xff]  ;;  %v746_v47 = vld [vmem:[%s3909_s1] sm:$0xff]  ;;  %v749_v38 = vld [vmem:[%s3909_s1 + $0x18] sm:$0xff] }
  0x7e   :  { %4238 = vst [vmem:[#allocation48_spill] sm:$0xff] %v2924_v39  ;;  %v2959_v33 = vadd.s32 %v2494_v62, %v4251_v45  ;;  %v2964_v34 = vadd.s32 %v2494_v62, %v4253_v46 }
  0x7f   :  { %4240 = vst [vmem:[#allocation49_spill] sm:$0xff] %v2929_v40  ;;  %v2974_v44 = vadd.s32 %v2494_v62, %v4257_v57  ;;  %v747_v57 = vld [vmem:[%s3909_s1 + $0x8] sm:$0xff] }
  0x80   :  { %4242 = vst [vmem:[#allocation59_spill] sm:$0xff] %v2934_v41 }
  0x81   :  { %4244 = vst [vmem:[#allocation60_spill] sm:$0xff] %v2939_v42 }
  0x82   :  { %4246 = vst [vmem:[#allocation61_spill] sm:$0xff] %v2944_v49  ;;  %v875_v49 = vsub.f32 %v619_v61, %v747_v57 }
  0x83   :  { %4248 = vst [vmem:[#allocation62_spill] sm:$0xff] %v2949_v58  ;;  %v874_v58 = vsub.f32 %v618_v0, %v746_v47 }
  0x84   :  { %4250 = vst [vmem:[#allocation63_spill] sm:$0xff] %v2954_v60  ;;  %v4259_v60 = vld [vmem:[#allocation6_spill] sm:$0xff]  ;;  %v1260_v35 = vmul.f32 %v875_v49, %v875_v49 }
  0x85   :  { %4252 = vst [vmem:[#allocation64_spill] sm:$0xff] %v2959_v33  ;;  %v232_v63 = vadd.s32 8, %v4259_v60  ;;  %v233_v45 = vadd.s32 16, %v4259_v60  ;;  %v234_v46 = vadd.s32 24, %v4259_v60  ;;  %v359_v56 = vmul.u32 128, %v4259_v60  ;;  %v620_v33 = vld [vmem:[%s3908_s0 + $0x10] sm:$0xff] }
  0x86   :  { %4254 = vst [vmem:[#allocation65_spill] sm:$0xff] %v2964_v34  ;;  %v236_v42 = vadd.s32 40, %v4259_v60  ;;  %v237_v36 = vadd.s32 48, %v4259_v60  ;;  %v1259_v57 = vmul.f32 %v874_v58, %v874_v58  ;;  %v239_v31 = vadd.s32 64, %v4259_v60 }
  0x87   :  { %4256 = vst [vmem:[#allocation66_spill] sm:$0xff] %v2969_v54  ;;  %v360_v34 = vmul.u32 128, %v232_v63  ;;  %v361_v54 = vmul.u32 128, %v233_v45  ;;  %v748_v63 = vld [vmem:[%s3909_s1 + $0x10] sm:$0xff]  ;;  %v362_v41 = vmul.u32 128, %v234_v46  ;;  %v489_v40 = vadd.s32 %v2494_v62, %v359_v56  ;;  %v621_v45 = vld [vmem:[%s3908_s0 + $0x18] sm:$0xff] }
  0x88   :  { %4258 = vst [vmem:[#allocation67_spill] sm:$0xff] %v2974_v44  ;;  %v235_v44 = vadd.s32 32, %v4259_v60  ;;  %v876_v37 = vsub.f32 %v620_v33, %v748_v63  ;;  %v622_v46 = vld [vmem:[%s3908_s0 + $0x20] sm:$0xff]  ;;  %v238_v56 = vadd.s32 56, %v4259_v60  ;;  %v877_v47 = vsub.f32 %v621_v45, %v749_v38 }
  0x89   :  { %v490_v39 = vadd.s32 %v2494_v62, %v360_v34  ;;  %v491_v61 = vadd.s32 %v2494_v62, %v361_v54  ;;  %v750_v34 = vld [vmem:[%s3909_s1 + $0x20] sm:$0xff]  ;;  %v364_v43 = vmul.u32 128, %v236_v42  ;;  %v492_v33 = vadd.s32 %v2494_v62, %v362_v41  ;;  %v623_v54 = vld [vmem:[%s3908_s0 + $0x28] sm:$0xff]  ;;  %v624_v41 = vld [vmem:[%s3908_s0 + $0x30] sm:$0xff] }
  0x8a   :  { %v363_v0 = vmul.u32 128, %v235_v44  ;;  %v751_v44 = vld [vmem:[%s3909_s1 + $0x28] sm:$0xff]  ;;  %vm1131_vm0 = vcmp.lt.s32.totalorder %v489_v40, 49152  ;;  %v878_v63 = vsub.f32 %v622_v46, %v750_v34  ;;  %v1261_v32 = vmul.f32 %v876_v37, %v876_v37  ;;  %v752_v42 = vld [vmem:[%s3909_s1 + $0x30] sm:$0xff]  ;;  %v753_v34 = vld [vmem:[%s3909_s1 + $0x38] sm:$0xff] }
  0x8b   :  { %vm1132_vm1 = vcmp.lt.s32.totalorder %v490_v39, 49152  ;;  %v365_v38 = vmul.u32 128, %v237_v36  ;;  %vm1133_vm2 = vcmp.lt.s32.totalorder %v491_v61, 49152  ;;  %v879_v58 = vsub.f32 %v623_v54, %v751_v44 }
  0x8c   :  { %v493_v49 = vadd.s32 %v2494_v62, %v363_v0  ;;  %v1262_v45 = vmul.f32 %v877_v47, %v877_v47  ;;  %v1387_v40 = vsel %vm1131_vm0, %v1259_v57, 0.0  ;;  %v1388_v39 = vsel %vm1132_vm1, %v1260_v35, 0.0  ;;  %v625_v0 = vld [vmem:[%s3908_s0 + $0x38] sm:$0xff] }
  0x8d   :  { %v240_v37 = vadd.s32 72, %v4259_v60  ;;  %v366_v46 = vmul.u32 128, %v238_v56  ;;  %v494_v36 = vadd.s32 %v2494_v62, %v364_v43  ;;  %vm1134_vm3 = vcmp.lt.s32.totalorder %v492_v33, 49152  ;;  %v626_v43 = vld [vmem:[%s3908_s0 + $0x40] sm:$0xff] }
  0x8e   :  { %v241_v61 = vadd.s32 80, %v4259_v60  ;;  %v880_v54 = vsub.f32 %v624_v41, %v752_v42  ;;  %v1263_v47 = vmul.f32 %v878_v63, %v878_v63  ;;  %v1389_v57 = vsel %vm1133_vm2, %v1261_v32, 0.0  ;;  %v754_v56 = vld [vmem:[%s3909_s1 + $0x40] sm:$0xff]  ;;  %v627_v32 = vld [vmem:[%s3908_s0 + $0x48] sm:$0xff] }
  0x8f   :  { %v367_v35 = vmul.u32 128, %v239_v31  ;;  %v495_v44 = vadd.s32 %v2494_v62, %v365_v38  ;;  %vm1135_vm4 = vcmp.lt.s32.totalorder %v493_v49, 49152  ;;  %v1902_v30 = vadd.f32 %v1388_v39, %v1387_v40  ;;  %v755_v38 = vld [vmem:[%s3909_s1 + $0x48] sm:$0xff] }
  0x90   :  { %v242_v33 = vadd.s32 88, %v4259_v60  ;;  %v881_v29 = vsub.f32 %v625_v0, %v753_v34  ;;  %v1264_v28 = vmul.f32 %v879_v58, %v879_v58  ;;  %v1390_v41 = vsel %vm1134_vm3, %v1262_v45, 0.0 }
  0x91   :  { %v368_v63 = vmul.u32 128, %v240_v37  ;;  %v496_v31 = vadd.s32 %v2494_v62, %v366_v46  ;;  %vm1136_vm5 = vcmp.lt.s32.totalorder %v494_v36, 49152  ;;  %v1903_v42 = vadd.f32 %v1902_v30, %v1389_v57  ;;  %v628_v37 = vld [vmem:[%s3908_s0 + $0x50] sm:$0xff] }
  0x92   :  { %v243_v49 = vadd.s32 96, %v4259_v60  ;;  %v882_v40 = vsub.f32 %v626_v43, %v754_v56  ;;  %v1265_v39 = vmul.f32 %v880_v54, %v880_v54  ;;  %v1391_v0 = vsel %vm1135_vm4, %v1263_v47, 0.0  ;;  %v756_v46 = vld [vmem:[%s3909_s1 + $0x50] sm:$0xff]  ;;  %v629_v47 = vld [vmem:[%s3908_s0 + $0x58] sm:$0xff] }
  0x93   :  { %v369_v58 = vmul.u32 128, %v241_v61  ;;  %v497_v45 = vadd.s32 %v2494_v62, %v367_v35  ;;  %vm1137_vm6 = vcmp.lt.s32.totalorder %v495_v44, 49152  ;;  %v1904_v34 = vadd.f32 %v1903_v42, %v1390_v41  ;;  %v757_v35 = vld [vmem:[%s3909_s1 + $0x58] sm:$0xff] }
  0x94   :  { %v244_v30 = vadd.s32 104, %v4259_v60  ;;  %v883_v36 = vsub.f32 %v627_v32, %v755_v38  ;;  %v1266_v57 = vmul.f32 %v881_v29, %v881_v29  ;;  %v1392_v43 = vsel %vm1136_vm5, %v1264_v28, 0.0 }
  0x95   :  { %v370_v54 = vmul.u32 128, %v242_v33  ;;  %v498_v61 = vadd.s32 %v2494_v62, %v368_v63  ;;  %vm1138_vm7 = vcmp.lt.s32.totalorder %v496_v31, 49152  ;;  %v1905_v56 = vadd.f32 %v1904_v34, %v1391_v0  ;;  %v630_v33 = vld [vmem:[%s3908_s0 + $0x60] sm:$0xff] }
  0x96   :  { %v245_v44 = vadd.s32 112, %v4259_v60  ;;  %v884_v41 = vsub.f32 %v628_v37, %v756_v46  ;;  %v1267_v42 = vmul.f32 %v882_v40, %v882_v40  ;;  %v1393_v32 = vsel %vm1137_vm6, %v1265_v39, 0.0  ;;  %v758_v63 = vld [vmem:[%s3909_s1 + $0x60] sm:$0xff]  ;;  %v631_v39 = vld [vmem:[%s3908_s0 + $0x68] sm:$0xff] }
  0x97   :  { %v371_v29 = vmul.u32 128, %v243_v49  ;;  %v499_v28 = vadd.s32 %v2494_v62, %v369_v58  ;;  %vm1139_vm8 = vcmp.lt.s32.totalorder %v497_v45, 49152  ;;  %v1906_v38 = vadd.f32 %v1905_v56, %v1392_v43  ;;  %v759_v58 = vld [vmem:[%s3909_s1 + $0x68] sm:$0xff] }
  0x98   :  { %v246_v31 = vadd.s32 120, %v4259_v60  ;;  %v885_v0 = vsub.f32 %v629_v47, %v757_v35  ;;  %v1268_v34 = vmul.f32 %v883_v36, %v883_v36  ;;  %v1394_v37 = vsel %vm1138_vm7, %v1266_v57, 0.0  ;;  %v632_v57 = vld [vmem:[%s3908_s0 + $0x70] sm:$0xff] }
  0x99   :  { %v372_v40 = vmul.u32 128, %v244_v30  ;;  %v500_v49 = vadd.s32 %v2494_v62, %v370_v54  ;;  %vm1140_vm9 = vcmp.lt.s32.totalorder %v498_v61, 49152  ;;  %v1907_v46 = vadd.f32 %v1906_v38, %v1393_v32  ;;  %v760_v54 = vld [vmem:[%s3909_s1 + $0x70] sm:$0xff] }
  0x9a   :  { %v247_v45 = vadd.s32 128, %v4259_v60  ;;  %v886_v43 = vsub.f32 %v630_v33, %v758_v63  ;;  %v1269_v56 = vmul.f32 %v884_v41, %v884_v41  ;;  %v1395_v47 = vsel %vm1139_vm8, %v1267_v42, 0.0  ;;  %v633_v42 = vld [vmem:[%s3908_s0 + $0x78] sm:$0xff] }
  0x9b   :  { %v373_v36 = vmul.u32 128, %v245_v44  ;;  %v501_v30 = vadd.s32 %v2494_v62, %v371_v29  ;;  %vm1141_vm10 = vcmp.lt.s32.totalorder %v499_v28, 49152  ;;  %v1908_v35 = vadd.f32 %v1907_v46, %v1394_v37  ;;  %v761_v29 = vld [vmem:[%s3909_s1 + $0x78] sm:$0xff] }
  0x9c   :  { %v248_v61 = vadd.s32 136, %v4259_v60  ;;  %v887_v32 = vsub.f32 %v631_v39, %v759_v58  ;;  %v1270_v38 = vmul.f32 %v885_v0, %v885_v0  ;;  %v1396_v33 = vsel %vm1140_vm9, %v1268_v34, 0.0  ;;  %v634_v34 = vld [vmem:[%s3908_s0 + $0x80] sm:$0xff] }
  0x9d   :  { %v374_v41 = vmul.u32 128, %v246_v31  ;;  %v502_v44 = vadd.s32 %v2494_v62, %v372_v40  ;;  %vm1142_vm11 = vcmp.lt.s32.totalorder %v500_v49, 49152  ;;  %v1909_v63 = vadd.f32 %v1908_v35, %v1395_v47  ;;  %v762_v40 = vld [vmem:[%s3909_s1 + $0x80] sm:$0xff] }
  0x9e   :  { %v249_v28 = vadd.s32 144, %v4259_v60  ;;  %v888_v37 = vsub.f32 %v632_v57, %v760_v54  ;;  %v1271_v46 = vmul.f32 %v886_v43, %v886_v43  ;;  %v1397_v39 = vsel %vm1141_vm10, %v1269_v56, 0.0  ;;  %v635_v56 = vld [vmem:[%s3908_s0 + $0x88] sm:$0xff] }
  0x9f   :  { %v375_v0 = vmul.u32 128, %v247_v45  ;;  %v503_v31 = vadd.s32 %v2494_v62, %v373_v36  ;;  %vm1143_vm12 = vcmp.lt.s32.totalorder %v501_v30, 49152  ;;  %v1910_v58 = vadd.f32 %v1909_v63, %v1396_v33  ;;  %v763_v36 = vld [vmem:[%s3909_s1 + $0x88] sm:$0xff] }
  0xa0   :  { %v250_v49 = vadd.s32 152, %v4259_v60  ;;  %v889_v47 = vsub.f32 %v633_v42, %v761_v29  ;;  %v1272_v35 = vmul.f32 %v887_v32, %v887_v32  ;;  %v1398_v57 = vsel %vm1142_vm11, %v1270_v38, 0.0  ;;  %v636_v38 = vld [vmem:[%s3908_s0 + $0x90] sm:$0xff] }
  0xa1   :  { %v376_v43 = vmul.u32 128, %v248_v61  ;;  %v504_v45 = vadd.s32 %v2494_v62, %v374_v41  ;;  %vm1144_vm13 = vcmp.lt.s32.totalorder %v502_v44, 49152  ;;  %v1911_v54 = vadd.f32 %v1910_v58, %v1397_v39  ;;  %v764_v41 = vld [vmem:[%s3909_s1 + $0x90] sm:$0xff] }
  0xa2   :  { %v251_v30 = vadd.s32 160, %v4259_v60  ;;  %v890_v33 = vsub.f32 %v634_v34, %v762_v40  ;;  %v1273_v63 = vmul.f32 %v888_v37, %v888_v37  ;;  %v1399_v42 = vsel %vm1143_vm12, %v1271_v46, 0.0  ;;  %v637_v46 = vld [vmem:[%s3908_s0 + $0x98] sm:$0xff] }
  0xa3   :  { %v377_v32 = vmul.u32 128, %v249_v28  ;;  %v505_v61 = vadd.s32 %v2494_v62, %v375_v0  ;;  %vm1145_vm14 = vcmp.lt.s32.totalorder %v503_v31, 49152  ;;  %v1912_v29 = vadd.f32 %v1911_v54, %v1398_v57  ;;  %v765_v0 = vld [vmem:[%s3909_s1 + $0x98] sm:$0xff] }
  0xa4   :  { %v252_v44 = vadd.s32 168, %v4259_v60  ;;  %v891_v39 = vsub.f32 %v635_v56, %v763_v36  ;;  %v1274_v58 = vmul.f32 %v889_v47, %v889_v47  ;;  %v1400_v34 = vsel %vm1144_vm13, %v1272_v35, 0.0  ;;  %v638_v35 = vld [vmem:[%s3908_s0 + $0xa0] sm:$0xff] }
  0xa5   :  { %v378_v37 = vmul.u32 128, %v250_v49  ;;  %v506_v28 = vadd.s32 %v2494_v62, %v376_v43  ;;  %vm1146_vm15 = vcmp.lt.s32.totalorder %v504_v45, 49152  ;;  %v1913_v40 = vadd.f32 %v1912_v29, %v1399_v42  ;;  %v766_v43 = vld [vmem:[%s3909_s1 + $0xa0] sm:$0xff] }
  0xa6   :  { %v253_v31 = vadd.s32 176, %v4259_v60  ;;  %v892_v57 = vsub.f32 %v636_v38, %v764_v41  ;;  %v1275_v54 = vmul.f32 %v890_v33, %v890_v33  ;;  %v1401_v56 = vsel %vm1145_vm14, %v1273_v63, 0.0  ;;  %v639_v63 = vld [vmem:[%s3908_s0 + $0xa8] sm:$0xff] }
  0xa7   :  { %v379_v47 = vmul.u32 128, %v251_v30  ;;  %v507_v49 = vadd.s32 %v2494_v62, %v377_v32  ;;  %vm1147_vm0 = vcmp.lt.s32.totalorder %v505_v61, 49152  ;;  %v1914_v36 = vadd.f32 %v1913_v40, %v1400_v34  ;;  %v767_v32 = vld [vmem:[%s3909_s1 + $0xa8] sm:$0xff] }
  0xa8   :  { %v254_v45 = vadd.s32 184, %v4259_v60  ;;  %v893_v42 = vsub.f32 %v637_v46, %v765_v0  ;;  %v1276_v29 = vmul.f32 %v891_v39, %v891_v39  ;;  %v1402_v38 = vsel %vm1146_vm15, %v1274_v58, 0.0  ;;  %v640_v58 = vld [vmem:[%s3908_s0 + $0xb0] sm:$0xff] }
  0xa9   :  { %v380_v33 = vmul.u32 128, %v252_v44  ;;  %v508_v30 = vadd.s32 %v2494_v62, %v378_v37  ;;  %vm1148_vm1 = vcmp.lt.s32.totalorder %v506_v28, 49152  ;;  %v1915_v41 = vadd.f32 %v1914_v36, %v1401_v56  ;;  %v768_v37 = vld [vmem:[%s3909_s1 + $0xb0] sm:$0xff] }
  0xaa   :  { %v255_v61 = vadd.s32 192, %v4259_v60  ;;  %v894_v34 = vsub.f32 %v638_v35, %v766_v43  ;;  %v1277_v40 = vmul.f32 %v892_v57, %v892_v57  ;;  %v1403_v46 = vsel %vm1147_vm0, %v1275_v54, 0.0  ;;  %v641_v54 = vld [vmem:[%s3908_s0 + $0xb8] sm:$0xff] }
  0xab   :  { %v381_v39 = vmul.u32 128, %v253_v31  ;;  %v509_v44 = vadd.s32 %v2494_v62, %v379_v47  ;;  %vm1149_vm2 = vcmp.lt.s32.totalorder %v507_v49, 49152  ;;  %v1916_v0 = vadd.f32 %v1915_v41, %v1402_v38  ;;  %v769_v47 = vld [vmem:[%s3909_s1 + $0xb8] sm:$0xff] }
  0xac   :  { %v256_v28 = vadd.s32 200, %v4259_v60  ;;  %v895_v56 = vsub.f32 %v639_v63, %v767_v32  ;;  %v1278_v36 = vmul.f32 %v893_v42, %v893_v42  ;;  %v1404_v35 = vsel %vm1148_vm1, %v1276_v29, 0.0  ;;  %v642_v29 = vld [vmem:[%s3908_s0 + $0xc0] sm:$0xff] }
  0xad   :  { %v382_v57 = vmul.u32 128, %v254_v45  ;;  %v510_v31 = vadd.s32 %v2494_v62, %v380_v33  ;;  %vm1150_vm3 = vcmp.lt.s32.totalorder %v508_v30, 49152  ;;  %v1917_v43 = vadd.f32 %v1916_v0, %v1403_v46  ;;  %v770_v33 = vld [vmem:[%s3909_s1 + $0xc0] sm:$0xff] }
  0xae   :  { %v257_v49 = vadd.s32 208, %v4259_v60  ;;  %v896_v38 = vsub.f32 %v640_v58, %v768_v37  ;;  %v1279_v41 = vmul.f32 %v894_v34, %v894_v34  ;;  %v1405_v63 = vsel %vm1149_vm2, %v1277_v40, 0.0  ;;  %v643_v40 = vld [vmem:[%s3908_s0 + $0xc8] sm:$0xff] }
  0xaf   :  { %v383_v42 = vmul.u32 128, %v255_v61  ;;  %v511_v45 = vadd.s32 %v2494_v62, %v381_v39  ;;  %vm1151_vm4 = vcmp.lt.s32.totalorder %v509_v44, 49152  ;;  %v1918_v32 = vadd.f32 %v1917_v43, %v1404_v35  ;;  %v771_v39 = vld [vmem:[%s3909_s1 + $0xc8] sm:$0xff] }
  0xb0   :  { %v258_v30 = vadd.s32 216, %v4259_v60  ;;  %v897_v46 = vsub.f32 %v641_v54, %v769_v47  ;;  %v1280_v0 = vmul.f32 %v895_v56, %v895_v56  ;;  %v1406_v58 = vsel %vm1150_vm3, %v1278_v36, 0.0  ;;  %v644_v36 = vld [vmem:[%s3908_s0 + $0xd0] sm:$0xff] }
  0xb1   :  { %v384_v34 = vmul.u32 128, %v256_v28  ;;  %v512_v61 = vadd.s32 %v2494_v62, %v382_v57  ;;  %vm1152_vm5 = vcmp.lt.s32.totalorder %v510_v31, 49152  ;;  %v1919_v37 = vadd.f32 %v1918_v32, %v1405_v63  ;;  %v772_v57 = vld [vmem:[%s3909_s1 + $0xd0] sm:$0xff] }
  0xb2   :  { %v259_v44 = vadd.s32 224, %v4259_v60  ;;  %v898_v35 = vsub.f32 %v642_v29, %v770_v33  ;;  %v1281_v43 = vmul.f32 %v896_v38, %v896_v38  ;;  %v1407_v54 = vsel %vm1151_vm4, %v1279_v41, 0.0  ;;  %v645_v41 = vld [vmem:[%s3908_s0 + $0xd8] sm:$0xff] }
  0xb3   :  { %v385_v56 = vmul.u32 128, %v257_v49  ;;  %v513_v28 = vadd.s32 %v2494_v62, %v383_v42  ;;  %vm1153_vm6 = vcmp.lt.s32.totalorder %v511_v45, 49152  ;;  %v1920_v47 = vadd.f32 %v1919_v37, %v1406_v58  ;;  %v773_v42 = vld [vmem:[%s3909_s1 + $0xd8] sm:$0xff] }
  0xb4   :  { %v260_v31 = vadd.s32 232, %v4259_v60  ;;  %v899_v63 = vsub.f32 %v643_v40, %v771_v39  ;;  %v1282_v32 = vmul.f32 %v897_v46, %v897_v46  ;;  %v1408_v29 = vsel %vm1152_vm5, %v1280_v0, 0.0  ;;  %v646_v0 = vld [vmem:[%s3908_s0 + $0xe0] sm:$0xff] }
  0xb5   :  { %v386_v38 = vmul.u32 128, %v258_v30  ;;  %v514_v49 = vadd.s32 %v2494_v62, %v384_v34  ;;  %vm1154_vm7 = vcmp.lt.s32.totalorder %v512_v61, 49152  ;;  %v1921_v33 = vadd.f32 %v1920_v47, %v1407_v54  ;;  %v774_v34 = vld [vmem:[%s3909_s1 + $0xe0] sm:$0xff] }
  0xb6   :  { %v261_v45 = vadd.s32 240, %v4259_v60  ;;  %v900_v58 = vsub.f32 %v644_v36, %v772_v57  ;;  %v1283_v37 = vmul.f32 %v898_v35, %v898_v35  ;;  %v1409_v40 = vsel %vm1153_vm6, %v1281_v43, 0.0  ;;  %v647_v43 = vld [vmem:[%s3908_s0 + $0xe8] sm:$0xff] }
  0xb7   :  { %v387_v46 = vmul.u32 128, %v259_v44  ;;  %v515_v30 = vadd.s32 %v2494_v62, %v385_v56  ;;  %vm1155_vm8 = vcmp.lt.s32.totalorder %v513_v28, 49152  ;;  %v1922_v39 = vadd.f32 %v1921_v33, %v1408_v29  ;;  %v775_v56 = vld [vmem:[%s3909_s1 + $0xe8] sm:$0xff] }
  0xb8   :  { %v262_v61 = vadd.s32 248, %v4259_v60  ;;  %v901_v54 = vsub.f32 %v645_v41, %v773_v42  ;;  %v1284_v47 = vmul.f32 %v899_v63, %v899_v63  ;;  %v1410_v36 = vsel %vm1154_vm7, %v1282_v32, 0.0  ;;  %v648_v32 = vld [vmem:[%s3908_s0 + $0xf0] sm:$0xff] }
  0xb9   :  { %v388_v35 = vmul.u32 128, %v260_v31  ;;  %v516_v44 = vadd.s32 %v2494_v62, %v386_v38  ;;  %vm1156_vm9 = vcmp.lt.s32.totalorder %v514_v49, 49152  ;;  %v1923_v57 = vadd.f32 %v1922_v39, %v1409_v40  ;;  %v776_v38 = vld [vmem:[%s3909_s1 + $0xf0] sm:$0xff] }
  0xba   :  { %v263_v28 = vadd.s32 256, %v4259_v60  ;;  %v902_v29 = vsub.f32 %v646_v0, %v774_v34  ;;  %v1285_v33 = vmul.f32 %v900_v58, %v900_v58  ;;  %v1411_v41 = vsel %vm1155_vm8, %v1283_v37, 0.0  ;;  %v777_v37 = vld [vmem:[%s3909_s1 + $0xf8] sm:$0xff] }
  0xbb   :  { %v389_v63 = vmul.u32 128, %v261_v45  ;;  %v517_v31 = vadd.s32 %v2494_v62, %v387_v46  ;;  %vm1157_vm10 = vcmp.lt.s32.totalorder %v515_v30, 49152  ;;  %v1924_v42 = vadd.f32 %v1923_v57, %v1410_v36  ;;  %v649_v45 = vld [vmem:[%s3908_s0 + $0xf8] sm:$0xff] }
  0xbc   :  { %v903_v49 = vsub.f32 %v647_v43, %v775_v56  ;;  %v1286_v40 = vmul.f32 %v901_v54, %v901_v54  ;;  %v1412_v39 = vsel %vm1156_vm9, %v1284_v47, 0.0  ;;  %v390_v60 = vmul.u32 128, %v262_v61  ;;  %v650_v61 = vld [vmem:[%s3908_s0 + $0x100] sm:$0xff] }
  0xbd   :  { %v518_v58 = vadd.s32 %v2494_v62, %v388_v35  ;;  %vm1158_vm11 = vcmp.lt.s32.totalorder %v516_v44, 49152  ;;  %v1925_v46 = vadd.f32 %v1924_v42, %v1411_v41  ;;  %v904_v0 = vsub.f32 %v648_v32, %v776_v38  ;;  %v778_v47 = vld [vmem:[%s3909_s1 + $0x100] sm:$0xff]  ;;  %v652_v38 = vld [vmem:[%s3908_s0 + $0x110] sm:$0xff] }
  0xbe   :  { %v1287_v34 = vmul.f32 %v902_v29, %v902_v29  ;;  %v1413_v30 = vsel %vm1157_vm10, %v1285_v33, 0.0  ;;  %v391_v36 = vmul.u32 128, %v263_v28  ;;  %v519_v54 = vadd.s32 %v2494_v62, %v389_v63  ;;  %v651_v28 = vld [vmem:[%s3908_s0 + $0x108] sm:$0xff]  ;;  %v780_v42 = vld [vmem:[%s3909_s1 + $0x110] sm:$0xff] }
  0xbf   :  { %vm1159_vm12 = vcmp.lt.s32.totalorder %v517_v31, 49152  ;;  %v1926_v35 = vadd.f32 %v1925_v46, %v1412_v39  ;;  %v905_v43 = vsub.f32 %v649_v45, %v777_v37  ;;  %v1288_v56 = vmul.f32 %v903_v49, %v903_v49  ;;  %v779_v29 = vld [vmem:[%s3909_s1 + $0x108] sm:$0xff] }
  0xc0   :  { %v1414_v44 = vsel %vm1158_vm11, %v1286_v40, 0.0  ;;  %v520_v57 = vadd.s32 %v2494_v62, %v390_v60  ;;  %vm1160_vm13 = vcmp.lt.s32.totalorder %v518_v58, 49152  ;;  %v906_v41 = vsub.f32 %v650_v61, %v778_v47  ;;  %v653_v58 = vld [vmem:[%s3908_s0 + $0x118] sm:$0xff] }
  0xc1   :  { %v1927_v33 = vadd.f32 %v1926_v35, %v1413_v30  ;;  %v1289_v63 = vmul.f32 %v904_v0, %v904_v0  ;;  %v1415_v32 = vsel %vm1159_vm12, %v1287_v34, 0.0  ;;  %v521_v31 = vadd.s32 %v2494_v62, %v391_v36  ;;  %v781_v62 = vld [vmem:[%s3909_s1 + $0x118] sm:$0xff]  ;;  %v654_v34 = vld [vmem:[%s3908_s0 + $0x120] sm:$0xff]  ;;  %v655_v35 = vld [vmem:[%s3908_s0 + $0x128] sm:$0xff] }
  0xc2   :  { %vm1161_vm14 = vcmp.lt.s32.totalorder %v519_v54, 49152  ;;  %v907_v40 = vsub.f32 %v651_v28, %v779_v29  ;;  %v1290_v39 = vmul.f32 %v905_v43, %v905_v43  ;;  %v1416_v60 = vsel %vm1160_vm13, %v1288_v56, 0.0  ;;  %v782_v30 = vld [vmem:[%s3909_s1 + $0x120] sm:$0xff]  ;;  %v783_v43 = vld [vmem:[%s3909_s1 + $0x128] sm:$0xff]  ;;  %v656_v29 = vld [vmem:[%s3908_s0 + $0x130] sm:$0xff] }
  0xc3   :  { %v1928_v49 = vadd.f32 %v1927_v33, %v1414_v44  ;;  %vm1162_vm15 = vcmp.lt.s32.totalorder %v520_v57, 49152  ;;  %v908_v37 = vsub.f32 %v652_v38, %v780_v42  ;;  %v1291_v46 = vmul.f32 %v906_v41, %v906_v41  ;;  %v784_v33 = vld [vmem:[%s3909_s1 + $0x130] sm:$0xff]  ;;  %v785_v38 = vld [vmem:[%s3909_s1 + $0x138] sm:$0xff] }
  0xc4   :  { %v1417_v0 = vsel %vm1161_vm14, %v1289_v63, 0.0  ;;  %vm1163_vm0 = vcmp.lt.s32.totalorder %v521_v31, 49152  ;;  %v909_v54 = vsub.f32 %v653_v58, %v781_v62  ;;  %v1292_v61 = vmul.f32 %v907_v40, %v907_v40 }
  0xc5   :  { %v1929_v45 = vadd.f32 %v1928_v49, %v1415_v32  ;;  %v1418_v47 = vsel %vm1162_vm15, %v1290_v39, 0.0  ;;  %vm1164_vm1 = vcmp.lt.s32.totalorder %v2504_v55, 49152  ;;  %v910_v44 = vsub.f32 %v654_v34, %v782_v30  ;;  %v657_v55 = vld [vmem:[%s3908_s0 + $0x138] sm:$0xff] }
  0xc6   :  { %v1293_v57 = vmul.f32 %v908_v37, %v908_v37  ;;  %v1419_v28 = vsel %vm1163_vm0, %v1291_v46, 0.0  ;;  %vm1165_vm2 = vcmp.lt.s32.totalorder %v2509_v48, 49152  ;;  %v911_v63 = vsub.f32 %v655_v35, %v783_v43  ;;  %v658_v48 = vld [vmem:[%s3908_s0 + $0x140] sm:$0xff]  ;;  %v787_v46 = vld [vmem:[%s3909_s1 + $0x148] sm:$0xff] }
  0xc7   :  { %v1930_v36 = vadd.f32 %v1929_v45, %v1416_v60  ;;  %v1294_v32 = vmul.f32 %v909_v54, %v909_v54  ;;  %v1420_v31 = vsel %vm1164_vm1, %v1292_v61, 0.0  ;;  %vm1166_vm3 = vcmp.lt.s32.totalorder %v2514_v51, 49152  ;;  %v786_v60 = vld [vmem:[%s3909_s1 + $0x140] sm:$0xff]  ;;  %v659_v51 = vld [vmem:[%s3908_s0 + $0x148] sm:$0xff]  ;;  %v788_v54 = vld [vmem:[%s3909_s1 + $0x150] sm:$0xff] }
  0xc8   :  { %v912_v49 = vsub.f32 %v656_v29, %v784_v33  ;;  %v1295_v40 = vmul.f32 %v910_v44, %v910_v44  ;;  %v1421_v39 = vsel %vm1165_vm2, %v1293_v57, 0.0  ;;  %vm1167_vm4 = vcmp.lt.s32.totalorder %v2519_v53, 49152  ;;  %v660_v53 = vld [vmem:[%s3908_s0 + $0x150] sm:$0xff]  ;;  %v790_v33 = vld [vmem:[%s3909_s1 + $0x160] sm:$0xff] }
  0xc9   :  { %v1931_v56 = vadd.f32 %v1930_v36, %v1417_v0  ;;  %v913_v62 = vsub.f32 %v657_v55, %v785_v38  ;;  %v1296_v45 = vmul.f32 %v911_v63, %v911_v63  ;;  %v1422_v37 = vsel %vm1166_vm3, %v1294_v32, 0.0  ;;  %v791_v55 = vld [vmem:[%s3909_s1 + $0x168] sm:$0xff] }
  0xca   :  { %vm1168_vm5 = vcmp.lt.s32.totalorder %v2524_v59, 49152  ;;  %v914_v34 = vsub.f32 %v658_v48, %v786_v60  ;;  %v1297_v30 = vmul.f32 %v912_v49, %v912_v49  ;;  %v1423_v36 = vsel %vm1167_vm4, %v1295_v40, 0.0  ;;  %v661_v59 = vld [vmem:[%s3908_s0 + $0x158] sm:$0xff] }
  0xcb   :  { %v1932_v41 = vadd.f32 %v1931_v56, %v1418_v47  ;;  %vm1169_vm6 = vcmp.lt.s32.totalorder %v2529_v1, 49152  ;;  %v915_v47 = vsub.f32 %v659_v51, %v787_v46  ;;  %v1298_v35 = vmul.f32 %v913_v62, %v913_v62  ;;  %v789_v56 = vld [vmem:[%s3909_s1 + $0x158] sm:$0xff]  ;;  %v662_v1 = vld [vmem:[%s3908_s0 + $0x160] sm:$0xff] }
  0xcc   :  { %v1424_v43 = vsel %vm1168_vm5, %v1296_v45, 0.0  ;;  %vm1170_vm7 = vcmp.lt.s32.totalorder %v2534_v50, 49152  ;;  %v916_v57 = vsub.f32 %v660_v53, %v788_v54  ;;  %v1425_v29 = vsel %vm1169_vm6, %v1297_v30, 0.0  ;;  %v663_v50 = vld [vmem:[%s3908_s0 + $0x168] sm:$0xff]  ;;  %v793_v45 = vld [vmem:[%s3909_s1 + $0x178] sm:$0xff] }
  0xcd   :  { %v1933_v42 = vadd.f32 %v1932_v41, %v1419_v28  ;;  %v1299_v28 = vmul.f32 %v914_v34, %v914_v34  ;;  %vm1171_vm8 = vcmp.lt.s32.totalorder %v2539_v52, 49152  ;;  %v917_v63 = vsub.f32 %v661_v59, %v789_v56  ;;  %v664_v52 = vld [vmem:[%s3908_s0 + $0x170] sm:$0xff]  ;;  %v794_v34 = vld [vmem:[%s3909_s1 + $0x180] sm:$0xff] }
  0xce   :  { %v1300_v32 = vmul.f32 %v915_v47, %v915_v47  ;;  %vm1172_vm9 = vcmp.lt.s32.totalorder %v2544_v2, 49152  ;;  %v1301_v49 = vmul.f32 %v916_v57, %v916_v57  ;;  %vm1173_vm10 = vcmp.lt.s32.totalorder %v2549_v3, 49152  ;;  %v665_v2 = vld [vmem:[%s3908_s0 + $0x178] sm:$0xff]  ;;  %v666_v3 = vld [vmem:[%s3908_s0 + $0x180] sm:$0xff]  ;;  %v796_v56 = vld [vmem:[%s3909_s1 + $0x190] sm:$0xff] }
  0xcf   :  { %v1934_v58 = vadd.f32 %v1933_v42, %v1420_v31  ;;  %v1426_v31 = vsel %vm1170_vm7, %v1298_v35, 0.0  ;;  %v918_v42 = vsub.f32 %v662_v1, %v790_v33  ;;  %v1427_v40 = vsel %vm1171_vm8, %v1299_v28, 0.0  ;;  %v797_v1 = vld [vmem:[%s3909_s1 + $0x198] sm:$0xff] }
  0xd0   :  { %v919_v60 = vsub.f32 %v663_v50, %v791_v55  ;;  %v1428_v62 = vsel %vm1172_vm9, %v1300_v32, 0.0  ;;  %vm1174_vm11 = vcmp.lt.s32.totalorder %v2554_v4, 49152  ;;  %vm1175_vm12 = vcmp.lt.s32.totalorder %v2559_v5, 49152  ;;  %v667_v4 = vld [vmem:[%s3908_s0 + $0x188] sm:$0xff]  ;;  %v668_v5 = vld [vmem:[%s3908_s0 + $0x190] sm:$0xff] }
  0xd1   :  { %v1935_v0 = vadd.f32 %v1934_v58, %v1421_v39  ;;  %v792_v39 = vld [vmem:[%s3909_s1 + $0x170] sm:$0xff]  ;;  %v1302_v58 = vmul.f32 %v917_v63, %v917_v63  ;;  %v1303_v46 = vmul.f32 %v918_v42, %v918_v42  ;;  %vm1176_vm13 = vcmp.lt.s32.totalorder %v2564_v6, 49152  ;;  %v669_v6 = vld [vmem:[%s3908_s0 + $0x198] sm:$0xff] }
  0xd2   :  { %v920_v51 = vsub.f32 %v664_v52, %v792_v39  ;;  %v1304_v53 = vmul.f32 %v919_v60, %v919_v60  ;;  %v922_v35 = vsub.f32 %v666_v3, %v794_v34  ;;  %vm1177_vm14 = vcmp.lt.s32.totalorder %v2569_v7, 49152  ;;  %v670_v7 = vld [vmem:[%s3908_s0 + $0x1a0] sm:$0xff]  ;;  %v800_v60 = vld [vmem:[%s3909_s1 + $0x1b0] sm:$0xff] }
  0xd3   :  { %v1936_v61 = vadd.f32 %v1935_v0, %v1422_v37  ;;  %v1429_v0 = vsel %vm1173_vm10, %v1301_v49, 0.0  ;;  %v1430_v54 = vsel %vm1174_vm11, %v1302_v58, 0.0  ;;  %v1431_v59 = vsel %vm1175_vm12, %v1303_v46, 0.0  ;;  %v799_v49 = vld [vmem:[%s3909_s1 + $0x1a8] sm:$0xff]  ;;  %v802_v34 = vld [vmem:[%s3909_s1 + $0x1c0] sm:$0xff] }
  0xd4   :  { %vm1178_vm15 = vcmp.lt.s32.totalorder %v2574_v8, 49152  ;;  %v1307_v63 = vmul.f32 %v922_v35, %v922_v35  ;;  %vm1179_vm0 = vcmp.lt.s32.totalorder %v2579_v9, 49152  ;;  %v925_v55 = vsub.f32 %v669_v6, %v797_v1  ;;  %v671_v8 = vld [vmem:[%s3908_s0 + $0x1a8] sm:$0xff]  ;;  %v672_v9 = vld [vmem:[%s3908_s0 + $0x1b0] sm:$0xff] }
  0xd5   :  { %v1937_v44 = vadd.f32 %v1936_v61, %v1423_v36  ;;  %v921_v36 = vsub.f32 %v665_v2, %v793_v45  ;;  %v795_v61 = vld [vmem:[%s3909_s1 + $0x188] sm:$0xff]  ;;  %vm1180_vm1 = vcmp.lt.s32.totalorder %v2584_v10, 49152  ;;  %vm1181_vm2 = vcmp.lt.s32.totalorder %v2589_v11, 49152  ;;  %v673_v10 = vld [vmem:[%s3908_s0 + $0x1b8] sm:$0xff]  ;;  %v674_v11 = vld [vmem:[%s3908_s0 + $0x1c0] sm:$0xff] }
  0xd6   :  { %v923_v57 = vsub.f32 %v667_v4, %v795_v61  ;;  %v1310_v2 = vmul.f32 %v925_v55, %v925_v55  ;;  %vm1182_vm3 = vcmp.lt.s32.totalorder %v2594_v12, 49152  ;;  %v928_v46 = vsub.f32 %v672_v9, %v800_v60  ;;  %v675_v12 = vld [vmem:[%s3908_s0 + $0x1c8] sm:$0xff]  ;;  %v809_v9 = vld [vmem:[%s3909_s1 + $0x1f8] sm:$0xff] }
  0xd7   :  { %v1938_v41 = vadd.f32 %v1937_v44, %v1424_v43  ;;  %v1305_v43 = vmul.f32 %v920_v51, %v920_v51  ;;  %v1306_v28 = vmul.f32 %v921_v36, %v921_v36  ;;  %vm1183_vm4 = vcmp.lt.s32.totalorder %v2599_v13, 49152  ;;  %v803_v4 = vld [vmem:[%s3909_s1 + $0x1c8] sm:$0xff]  ;;  %v676_v13 = vld [vmem:[%s3908_s0 + $0x1d0] sm:$0xff] }
  0xd8   :  { %vm1184_vm5 = vcmp.lt.s32.totalorder %v2604_v14, 49152  ;;  %v1313_v35 = vmul.f32 %v928_v46, %v928_v46  ;;  %vm1185_vm6 = vcmp.lt.s32.totalorder %v2609_v15, 49152  ;;  %v677_v14 = vld [vmem:[%s3908_s0 + $0x1d8] sm:$0xff]  ;;  %vm1186_vm7 = vcmp.lt.s32.totalorder %v2614_v16, 49152  ;;  %v678_v15 = vld [vmem:[%s3908_s0 + $0x1e0] sm:$0xff]  ;;  %v679_v16 = vld [vmem:[%s3908_s0 + $0x1e8] sm:$0xff] }
  0xd9   :  { %v1939_v38 = vadd.f32 %v1938_v41, %v1425_v29  ;;  %v1432_v29 = vsel %vm1176_vm13, %v1304_v53, 0.0  ;;  %v924_v41 = vsub.f32 %v668_v5, %v796_v56  ;;  %v1433_v32 = vsel %vm1177_vm14, %v1305_v43, 0.0 }
  0xda   :  { %v1434_v42 = vsel %vm1178_vm15, %v1306_v28, 0.0  ;;  %v931_v56 = vsub.f32 %v675_v12, %v803_v4  ;;  %v805_v28 = vld [vmem:[%s3909_s1 + $0x1d8] sm:$0xff]  ;;  %vm1187_vm8 = vcmp.lt.s32.totalorder %v2619_v17, 49152  ;;  %vm1188_vm9 = vcmp.lt.s32.totalorder %v2624_v18, 49152  ;;  %v680_v17 = vld [vmem:[%s3908_s0 + $0x1f0] sm:$0xff] }
  0xdb   :  { %v1940_v48 = vadd.f32 %v1939_v38, %v1426_v31  ;;  %v798_v31 = vld [vmem:[%s3909_s1 + $0x1a0] sm:$0xff]  ;;  %v1308_v38 = vmul.f32 %v923_v57, %v923_v57  ;;  %v1309_v39 = vmul.f32 %v924_v41, %v924_v41  ;;  %vm1189_vm10 = vcmp.lt.s32.totalorder %v2629_v19, 49152  ;;  %v681_v18 = vld [vmem:[%s3908_s0 + $0x1f8] sm:$0xff] }
  0xdc   :  { %v926_v52 = vsub.f32 %v670_v7, %v798_v31  ;;  %v806_v41 = vld [vmem:[%s3909_s1 + $0x1e0] sm:$0xff]  ;;  %v1316_v7 = vmul.f32 %v931_v56, %v931_v56  ;;  %vm1190_vm11 = vcmp.lt.s32.totalorder %v2634_v20, 49152  ;;  %vm1191_vm12 = vcmp.lt.s32.totalorder %v2639_v21, 49152  ;;  %v683_v20 = vld [vmem:[%s3908_s0 + $0x208] sm:$0xff]  ;;  %v684_v21 = vld [vmem:[%s3908_s0 + $0x210] sm:$0xff] }
  0xdd   :  { %v1941_v37 = vadd.f32 %v1940_v48, %v1427_v40  ;;  %v1435_v48 = vsel %vm1179_vm0, %v1307_v63, 0.0  ;;  %v1436_v45 = vsel %vm1180_vm1, %v1308_v38, 0.0  ;;  %v1437_v3 = vsel %vm1181_vm2, %v1309_v39, 0.0  ;;  %v682_v19 = vld [vmem:[%s3908_s0 + $0x200] sm:$0xff] }
  0xde   :  { %v934_v38 = vsub.f32 %v678_v15, %v806_v41  ;;  %vm1192_vm13 = vcmp.lt.s32.totalorder %v2644_v22, 49152  ;;  %vm1193_vm14 = vcmp.lt.s32.totalorder %v2649_v23, 49152  ;;  %v685_v22 = vld [vmem:[%s3908_s0 + $0x218] sm:$0xff]  ;;  %vm1194_vm15 = vcmp.lt.s32.totalorder %v2654_v24, 49152  ;;  %v686_v23 = vld [vmem:[%s3908_s0 + $0x220] sm:$0xff]  ;;  %v687_v24 = vld [vmem:[%s3908_s0 + $0x228] sm:$0xff] }
  0xdf   :  { %v1942_v30 = vadd.f32 %v1941_v37, %v1428_v62  ;;  %v927_v62 = vsub.f32 %v671_v8, %v799_v49  ;;  %v801_v37 = vld [vmem:[%s3909_s1 + $0x1b8] sm:$0xff]  ;;  %v808_v49 = vld [vmem:[%s3909_s1 + $0x1f0] sm:$0xff]  ;;  %vm1195_vm0 = vcmp.lt.s32.totalorder %v2659_v25, 49152  ;;  %vm1196_vm1 = vcmp.lt.s32.totalorder %v2664_v26, 49152 }
  0xe0   :  { %v929_v36 = vsub.f32 %v673_v10, %v801_v37  ;;  %v937_v37 = vsub.f32 %v681_v18, %v809_v9  ;;  %v688_v25 = vld [vmem:[%s3908_s0 + $0x230] sm:$0xff]  ;;  %vm1197_vm2 = vcmp.lt.s32.totalorder %v2669_v27, 49152  ;;  %v689_v26 = vld [vmem:[%s3908_s0 + $0x238] sm:$0xff]  ;;  %v690_v27 = vld [vmem:[%s3908_s0 + $0x240] sm:$0xff] }
  0xe1   :  { %v1943_v47 = vadd.f32 %v1942_v30, %v1429_v0  ;;  %v1311_v0 = vmul.f32 %v926_v52, %v926_v52  ;;  %v1312_v53 = vmul.f32 %v927_v62, %v927_v62  ;;  %v1319_v62 = vmul.f32 %v934_v38, %v934_v38  ;;  %v4262_v18 = vld [vmem:[#allocation51_spill] sm:$0xff] }
  0xe2   :  { %v1322_v12 = vmul.f32 %v937_v37, %v937_v37 }
  0xe3   :  { %v1944_v44 = vadd.f32 %v1943_v47, %v1430_v54  ;;  %v1438_v54 = vsel %vm1182_vm3, %v1310_v2, 0.0  ;;  %v930_v47 = vsub.f32 %v674_v11, %v802_v34  ;;  %v1439_v43 = vsel %vm1183_vm4, %v1311_v0, 0.0  ;;  %v811_v0 = vld [vmem:[%s3909_s1 + $0x208] sm:$0xff] }
  0xe4   :  { %v1440_v57 = vsel %vm1184_vm5, %v1312_v53, 0.0  ;;  %vm1200_vm5 = vcmp.lt.s32.totalorder %v4262_v18, 49152 }
  0xe5   :  { %v1945_v33 = vadd.f32 %v1944_v44, %v1431_v59  ;;  %v804_v59 = vld [vmem:[%s3909_s1 + $0x1d0] sm:$0xff]  ;;  %v1314_v44 = vmul.f32 %v929_v36, %v929_v36  ;;  %v1315_v1 = vmul.f32 %v930_v47, %v930_v47 }
  0xe6   :  { %v932_v6 = vsub.f32 %v676_v13, %v804_v59  ;;  %v812_v36 = vld [vmem:[%s3909_s1 + $0x210] sm:$0xff]  ;;  %v814_v59 = vld [vmem:[%s3909_s1 + $0x220] sm:$0xff] }
  0xe7   :  { %v1946_v50 = vadd.f32 %v1945_v33, %v1432_v29  ;;  %v1441_v33 = vsel %vm1185_vm6, %v1313_v35, 0.0  ;;  %v1442_v31 = vsel %vm1186_vm7, %v1314_v44, 0.0  ;;  %v1443_v8 = vsel %vm1187_vm8, %v1315_v1, 0.0 }
  0xe8   :  { %v940_v35 = vsub.f32 %v684_v21, %v812_v36  ;;  %v694_v36 = vld [vmem:[%s3908_s0 + $0x260] sm:$0xff] }
  0xe9   :  { %v1947_v40 = vadd.f32 %v1946_v50, %v1433_v32  ;;  %v933_v32 = vsub.f32 %v677_v14, %v805_v28  ;;  %v807_v50 = vld [vmem:[%s3909_s1 + $0x1e8] sm:$0xff] }
  0xea   :  { %v935_v52 = vsub.f32 %v679_v16, %v807_v50  ;;  %v815_v14 = vld [vmem:[%s3909_s1 + $0x228] sm:$0xff] }
  0xeb   :  { %v1948_v58 = vadd.f32 %v1947_v40, %v1434_v42  ;;  %v1317_v42 = vmul.f32 %v932_v6, %v932_v6  ;;  %v1318_v39 = vmul.f32 %v933_v32, %v933_v32  ;;  %v1325_v6 = vmul.f32 %v940_v35, %v940_v35  ;;  %v823_v35 = vld [vmem:[%s3909_s1 + $0x268] sm:$0xff] }
  0xec   :  { %v943_v41 = vsub.f32 %v687_v24, %v815_v14 }
  0xed   :  { %v1949_v51 = vadd.f32 %v1948_v58, %v1435_v48  ;;  %v1444_v48 = vsel %vm1188_vm9, %v1316_v7, 0.0  ;;  %v936_v58 = vsub.f32 %v680_v17, %v808_v49  ;;  %v1445_v2 = vsel %vm1189_vm10, %v1317_v42, 0.0  ;;  %v817_v7 = vld [vmem:[%s3909_s1 + $0x238] sm:$0xff]  ;;  %v818_v42 = vld [vmem:[%s3909_s1 + $0x240] sm:$0xff] }
  0xee   :  { %v1446_v46 = vsel %vm1190_vm11, %v1318_v39, 0.0  ;;  %v1453_v38 = vsel %vm1197_vm2, %v1325_v6, 0.0  ;;  %v945_v49 = vsub.f32 %v689_v26, %v817_v7  ;;  %v691_v39 = vld [vmem:[%s3908_s0 + $0x248] sm:$0xff]  ;;  %v697_v6 = vld [vmem:[%s3908_s0 + $0x278] sm:$0xff]  ;;  %v826_v26 = vld [vmem:[%s3909_s1 + $0x280] sm:$0xff] }
  0xef   :  { %v1950_v30 = vadd.f32 %v1949_v51, %v1436_v45  ;;  %v810_v45 = vld [vmem:[%s3909_s1 + $0x200] sm:$0xff]  ;;  %v1320_v51 = vmul.f32 %v935_v52, %v935_v52  ;;  %v1321_v34 = vmul.f32 %v936_v58, %v936_v58 }
  0xf0   :  { %v938_v11 = vsub.f32 %v682_v19, %v810_v45  ;;  %v820_v19 = vld [vmem:[%s3909_s1 + $0x250] sm:$0xff]  ;;  %v4269_v7 = vld [vmem:[#allocation58_spill] sm:$0xff] }
  0xf1   :  { %v1951_v61 = vadd.f32 %v1950_v30, %v1437_v3  ;;  %v1447_v30 = vsel %vm1191_vm12, %v1319_v62, 0.0  ;;  %v1448_v4 = vsel %vm1192_vm13, %v1320_v51, 0.0  ;;  %v1449_v13 = vsel %vm1193_vm14, %v1321_v34, 0.0  ;;  %v4263_v45 = vld [vmem:[#allocation52_spill] sm:$0xff] }
  0xf2   :  { %vm1201_vm6 = vcmp.lt.s32.totalorder %v4263_v45, 49152  ;;  %v1330_v51 = vmul.f32 %v945_v49, %v945_v49  ;;  %vm1207_vm12 = vcmp.lt.s32.totalorder %v4269_v7, 49152 }
  0xf3   :  { %v1952_v5 = vadd.f32 %v1951_v61, %v1438_v54  ;;  %v939_v54 = vsub.f32 %v683_v20, %v811_v0  ;;  %v813_v61 = vld [vmem:[%s3909_s1 + $0x218] sm:$0xff] }
  0xf4   :  { %v941_v56 = vsub.f32 %v685_v22, %v813_v61  ;;  %v693_v20 = vld [vmem:[%s3908_s0 + $0x258] sm:$0xff] }
  0xf5   :  { %v1953_v29 = vadd.f32 %v1952_v5, %v1439_v43  ;;  %v1323_v43 = vmul.f32 %v938_v11, %v938_v11  ;;  %v1324_v44 = vmul.f32 %v939_v54, %v939_v54  ;;  %v821_v0 = vld [vmem:[%s3909_s1 + $0x258] sm:$0xff]  ;;  %v4265_v54 = vld [vmem:[#allocation54_spill] sm:$0xff] }
  0xf6   :  { %vm1203_vm8 = vcmp.lt.s32.totalorder %v4265_v54, 49152 }
  0xf7   :  { %v1954_v63 = vadd.f32 %v1953_v29, %v1440_v57  ;;  %v1450_v57 = vsel %vm1194_vm15, %v1322_v12, 0.0  ;;  %v942_v29 = vsub.f32 %v686_v23, %v814_v59  ;;  %v1451_v1 = vsel %vm1195_vm0, %v1323_v43, 0.0  ;;  %v4266_v43 = vld [vmem:[#allocation55_spill] sm:$0xff] }
  0xf8   :  { %v1452_v32 = vsel %vm1196_vm1, %v1324_v44, 0.0  ;;  %vm1204_vm9 = vcmp.lt.s32.totalorder %v4266_v43, 49152  ;;  %v824_v44 = vld [vmem:[%s3909_s1 + $0x270] sm:$0xff] }
  0xf9   :  { %v1955_v55 = vadd.f32 %v1954_v63, %v1441_v33  ;;  %v816_v33 = vld [vmem:[%s3909_s1 + $0x230] sm:$0xff]  ;;  %v1326_v63 = vmul.f32 %v941_v56, %v941_v56 }
  0xfa   :  { %v944_v50 = vsub.f32 %v688_v25, %v816_v33  ;;  %v696_v56 = vld [vmem:[%s3908_s0 + $0x270] sm:$0xff]  ;;  %v4268_v25 = vld [vmem:[#allocation57_spill] sm:$0xff] }
  0xfb   :  { %v1956_v40 = vadd.f32 %v1955_v55, %v1442_v31  ;;  %v4260_v31 = vld [vmem:[#allocation45_spill] sm:$0xff]  ;;  %v1327_v55 = vmul.f32 %v942_v29, %v942_v29  ;;  %vm1206_vm11 = vcmp.lt.s32.totalorder %v4268_v25, 49152 }
  0xfc   :  { %vm1198_vm3 = vcmp.lt.s32.totalorder %v4260_v31, 49152  ;;  %v1329_v58 = vmul.f32 %v944_v50, %v944_v50 }
  0xfd   :  { %v1957_v60 = vadd.f32 %v1956_v40, %v1443_v8  ;;  %v4261_v8 = vld [vmem:[#allocation50_spill] sm:$0xff]  ;;  %v1328_v40 = vmul.f32 %v943_v41, %v943_v41  ;;  %v1454_v52 = vsel %vm1198_vm3, %v1326_v63, 0.0 }
  0xfe   :  { %vm1199_vm4 = vcmp.lt.s32.totalorder %v4261_v8, 49152  ;;  %v1457_v21 = vsel %vm1201_vm6, %v1329_v58, 0.0 }
  0xff   :  { %v1958_v10 = vadd.f32 %v1957_v60, %v1444_v48  ;;  %v819_v48 = vld [vmem:[%s3909_s1 + $0x248] sm:$0xff]  ;;  %v946_v60 = vsub.f32 %v690_v27, %v818_v42  ;;  %v1455_v62 = vsel %vm1199_vm4, %v1327_v55, 0.0 }
 0x100   :  { %v947_v37 = vsub.f32 %v691_v39, %v819_v48  ;;  %v827_v27 = vld [vmem:[%s3909_s1 + $0x288] sm:$0xff]  ;;  %v828_v39 = vld [vmem:[%s3909_s1 + $0x290] sm:$0xff] }
 0x101   :  { %v1959_v3 = vadd.f32 %v1958_v10, %v1445_v2  ;;  %v692_v2 = vld [vmem:[%s3908_s0 + $0x250] sm:$0xff] }
 0x102   :  { %v948_v34 = vsub.f32 %v692_v2, %v820_v19  ;;  %v1332_v22 = vmul.f32 %v947_v37, %v947_v37  ;;  %v4270_v42 = vld [vmem:[#allocation7_spill] sm:$0xff]  ;;  %v4271_v48 = vld [vmem:[#allocation8_spill] sm:$0xff]  ;;  %v4272_v19 = vld [vmem:[#allocation9_spill] sm:$0xff] }
 0x103   :  { %v1960_v53 = vadd.f32 %v1959_v3, %v1446_v46  ;;  %v1456_v46 = vsel %vm1200_vm5, %v1328_v40, 0.0  ;;  %v4264_v3 = vld [vmem:[#allocation53_spill] sm:$0xff]  ;;  %vm1208_vm13 = vcmp.lt.s32.totalorder %v4270_v42, 49152  ;;  %vm1209_vm14 = vcmp.lt.s32.totalorder %v4271_v48, 49152 }
 0x104   :  { %vm1202_vm7 = vcmp.lt.s32.totalorder %v4264_v3, 49152  ;;  %v1333_v59 = vmul.f32 %v948_v34, %v948_v34  ;;  %v1460_v29 = vsel %vm1204_vm9, %v1332_v22, 0.0  ;;  %v829_v2 = vld [vmem:[%s3909_s1 + $0x298] sm:$0xff]  ;;  %vm1210_vm15 = vcmp.lt.s32.totalorder %v4272_v19, 49152 }
 0x105   :  { %v1961_v47 = vadd.f32 %v1960_v53, %v1447_v30  ;;  %v1331_v30 = vmul.f32 %v946_v60, %v946_v60  ;;  %v822_v53 = vld [vmem:[%s3909_s1 + $0x260] sm:$0xff]  ;;  %v1458_v61 = vsel %vm1202_vm7, %v1330_v51, 0.0 }
 0x106   :  { %v950_v23 = vsub.f32 %v694_v36, %v822_v53  ;;  %v831_v36 = vld [vmem:[%s3909_s1 + $0x2a8] sm:$0xff] }
 0x107   :  { %v1962_v5 = vadd.f32 %v1961_v47, %v1448_v4  ;;  %v949_v4 = vsub.f32 %v693_v20, %v821_v0  ;;  %v695_v47 = vld [vmem:[%s3908_s0 + $0x268] sm:$0xff]  ;;  %v830_v20 = vld [vmem:[%s3909_s1 + $0x2a0] sm:$0xff] }
 0x108   :  { %v951_v14 = vsub.f32 %v695_v47, %v823_v35  ;;  %v1335_v41 = vmul.f32 %v950_v23, %v950_v23  ;;  %v4273_v0 = vld [vmem:[#allocation10_spill] sm:$0xff]  ;;  %v4274_v53 = vld [vmem:[#allocation11_spill] sm:$0xff]  ;;  %v4275_v35 = vld [vmem:[#allocation12_spill] sm:$0xff] }
 0x109   :  { %v1963_v28 = vadd.f32 %v1962_v5, %v1449_v13  ;;  %v1459_v5 = vsel %vm1203_vm8, %v1331_v30, 0.0  ;;  %vm1211_vm0 = vcmp.lt.s32.totalorder %v4273_v0, 49152  ;;  %vm1212_vm1 = vcmp.lt.s32.totalorder %v4274_v53, 49152  ;;  %v832_v47 = vld [vmem:[%s3909_s1 + $0x2b0] sm:$0xff] }
 0x10a   :  { %v1336_v50 = vmul.f32 %v951_v14, %v951_v14  ;;  %v1463_v40 = vsel %vm1207_vm12, %v1335_v41, 0.0  ;;  %vm1213_vm2 = vcmp.lt.s32.totalorder %v4275_v35, 49152 }
 0x10b   :  { %v1964_v15 = vadd.f32 %v1963_v28, %v1450_v57  ;;  %v4267_v57 = vld [vmem:[#allocation56_spill] sm:$0xff]  ;;  %v1334_v28 = vmul.f32 %v949_v4, %v949_v4 }
 0x10c   :  { %vm1205_vm10 = vcmp.lt.s32.totalorder %v4267_v57, 49152  ;;  %v1464_v58 = vsel %vm1208_vm13, %v1336_v50, 0.0 }
 0x10d   :  { %v1965_v16 = vadd.f32 %v1964_v15, %v1451_v1  ;;  %v825_v1 = vld [vmem:[%s3909_s1 + $0x278] sm:$0xff]  ;;  %v952_v15 = vsub.f32 %v696_v56, %v824_v44  ;;  %v1461_v63 = vsel %vm1205_vm10, %v1333_v59, 0.0  ;;  %v1462_v55 = vsel %vm1206_vm11, %v1334_v28, 0.0 }
 0x10e   :  { %v833_v56 = vld [vmem:[%s3909_s1 + $0x2b8] sm:$0xff] }
 0x10f   :  { %v1966_v17 = vadd.f32 %v1965_v16, %v1452_v32  ;;  %v698_v32 = vld [vmem:[%s3908_s0 + $0x280] sm:$0xff]  ;;  %v953_v16 = vsub.f32 %v697_v6, %v825_v1  ;;  %v1337_v49 = vmul.f32 %v952_v15, %v952_v15 }
 0x110   :  { %v4276_v44 = vld [vmem:[#allocation13_spill] sm:$0xff]  ;;  %v4277_v1 = vld [vmem:[#allocation14_spill] sm:$0xff] }
 0x111   :  { %v1967_v9 = vadd.f32 %v1966_v17, %v1453_v38  ;;  %v699_v38 = vld [vmem:[%s3908_s0 + $0x288] sm:$0xff]  ;;  %v954_v17 = vsub.f32 %v698_v32, %v826_v26  ;;  %v1338_v60 = vmul.f32 %v953_v16, %v953_v16  ;;  %v1465_v51 = vsel %vm1209_vm14, %v1337_v49, 0.0  ;;  %v834_v6 = vld [vmem:[%s3909_s1 + $0x2c0] sm:$0xff] }
 0x112   :  { %vm1214_vm3 = vcmp.lt.s32.totalorder %v4276_v44, 49152  ;;  %vm1215_vm4 = vcmp.lt.s32.totalorder %v4277_v1, 49152  ;;  %v835_v32 = vld [vmem:[%s3909_s1 + $0x2c8] sm:$0xff] }
 0x113   :  { %v1968_v10 = vadd.f32 %v1967_v9, %v1454_v52  ;;  %v700_v52 = vld [vmem:[%s3908_s0 + $0x290] sm:$0xff]  ;;  %v955_v9 = vsub.f32 %v699_v38, %v827_v27  ;;  %v1339_v37 = vmul.f32 %v954_v17, %v954_v17  ;;  %v1466_v30 = vsel %vm1210_vm15, %v1338_v60, 0.0 }
 0x114   :  { %v4278_v26 = vld [vmem:[#allocation15_spill] sm:$0xff]  ;;  %v4279_v27 = vld [vmem:[#allocation16_spill] sm:$0xff] }
 0x115   :  { %v1969_v11 = vadd.f32 %v1968_v10, %v1455_v62  ;;  %v701_v62 = vld [vmem:[%s3908_s0 + $0x298] sm:$0xff]  ;;  %v956_v10 = vsub.f32 %v700_v52, %v828_v39  ;;  %v1340_v34 = vmul.f32 %v955_v9, %v955_v9  ;;  %v1467_v22 = vsel %vm1211_vm0, %v1339_v37, 0.0  ;;  %v836_v38 = vld [vmem:[%s3909_s1 + $0x2d0] sm:$0xff] }
 0x116   :  { %vm1216_vm5 = vcmp.lt.s32.totalorder %v4278_v26, 49152  ;;  %vm1217_vm6 = vcmp.lt.s32.totalorder %v4279_v27, 49152  ;;  %v837_v52 = vld [vmem:[%s3909_s1 + $0x2d8] sm:$0xff] }
 0x117   :  { %v1970_v12 = vadd.f32 %v1969_v11, %v1456_v46  ;;  %v702_v46 = vld [vmem:[%s3908_s0 + $0x2a0] sm:$0xff]  ;;  %v957_v11 = vsub.f32 %v701_v62, %v829_v2  ;;  %v1341_v4 = vmul.f32 %v956_v10, %v956_v10  ;;  %v1468_v59 = vsel %vm1212_vm1, %v1340_v34, 0.0 }
 0x118   :  { %v4280_v39 = vld [vmem:[#allocation17_spill] sm:$0xff]  ;;  %v4281_v2 = vld [vmem:[#allocation18_spill] sm:$0xff] }
 0x119   :  { %v1971_v13 = vadd.f32 %v1970_v12, %v1457_v21  ;;  %v703_v21 = vld [vmem:[%s3908_s0 + $0x2a8] sm:$0xff]  ;;  %v958_v12 = vsub.f32 %v702_v46, %v830_v20  ;;  %v1342_v23 = vmul.f32 %v957_v11, %v957_v11  ;;  %v1469_v28 = vsel %vm1213_vm2, %v1341_v4, 0.0  ;;  %v838_v62 = vld [vmem:[%s3909_s1 + $0x2e0] sm:$0xff] }
 0x11a   :  { %vm1218_vm7 = vcmp.lt.s32.totalorder %v4280_v39, 49152  ;;  %vm1219_vm8 = vcmp.lt.s32.totalorder %v4281_v2, 49152  ;;  %v839_v46 = vld [vmem:[%s3909_s1 + $0x2e8] sm:$0xff] }
 0x11b   :  { %v1972_v24 = vadd.f32 %v1971_v13, %v1458_v61  ;;  %v704_v61 = vld [vmem:[%s3908_s0 + $0x2b0] sm:$0xff]  ;;  %v959_v13 = vsub.f32 %v703_v21, %v831_v36  ;;  %v1343_v14 = vmul.f32 %v958_v12, %v958_v12  ;;  %v1470_v41 = vsel %vm1214_vm3, %v1342_v23, 0.0 }
 0x11c   :  { %v4282_v20 = vld [vmem:[#allocation19_spill] sm:$0xff]  ;;  %v4283_v36 = vld [vmem:[#allocation20_spill] sm:$0xff] }
 0x11d   :  { %v1973_v33 = vadd.f32 %v1972_v24, %v1459_v5  ;;  %v705_v5 = vld [vmem:[%s3908_s0 + $0x2b8] sm:$0xff]  ;;  %v960_v24 = vsub.f32 %v704_v61, %v832_v47  ;;  %v1344_v15 = vmul.f32 %v959_v13, %v959_v13  ;;  %v1471_v50 = vsel %vm1215_vm4, %v1343_v14, 0.0  ;;  %v840_v21 = vld [vmem:[%s3909_s1 + $0x2f0] sm:$0xff] }
 0x11e   :  { %vm1220_vm9 = vcmp.lt.s32.totalorder %v4282_v20, 49152  ;;  %vm1221_vm10 = vcmp.lt.s32.totalorder %v4283_v36, 49152  ;;  %v841_v61 = vld [vmem:[%s3909_s1 + $0x2f8] sm:$0xff] }
 0x11f   :  { %v1974_v31 = vadd.f32 %v1973_v33, %v1460_v29  ;;  %v706_v29 = vld [vmem:[%s3908_s0 + $0x2c0] sm:$0xff]  ;;  %v961_v33 = vsub.f32 %v705_v5, %v833_v56  ;;  %v1345_v16 = vmul.f32 %v960_v24, %v960_v24  ;;  %v1472_v49 = vsel %vm1216_vm5, %v1344_v15, 0.0 }
 0x120   :  { %v4284_v47 = vld [vmem:[#allocation21_spill] sm:$0xff]  ;;  %v4285_v56 = vld [vmem:[#allocation22_spill] sm:$0xff] }
 0x121   :  { %v1975_v8 = vadd.f32 %v1974_v31, %v1461_v63  ;;  %v707_v63 = vld [vmem:[%s3908_s0 + $0x2c8] sm:$0xff]  ;;  %v962_v31 = vsub.f32 %v706_v29, %v834_v6  ;;  %v1346_v17 = vmul.f32 %v961_v33, %v961_v33  ;;  %v1473_v60 = vsel %vm1217_vm6, %v1345_v16, 0.0  ;;  %v842_v5 = vld [vmem:[%s3909_s1 + $0x300] sm:$0xff] }
 0x122   :  { %vm1222_vm11 = vcmp.lt.s32.totalorder %v4284_v47, 49152  ;;  %vm1223_vm12 = vcmp.lt.s32.totalorder %v4285_v56, 49152  ;;  %v843_v29 = vld [vmem:[%s3909_s1 + $0x308] sm:$0xff] }
 0x123   :  { %v1976_v18 = vadd.f32 %v1975_v8, %v1462_v55  ;;  %v708_v55 = vld [vmem:[%s3908_s0 + $0x2d0] sm:$0xff]  ;;  %v963_v8 = vsub.f32 %v707_v63, %v835_v32  ;;  %v1347_v9 = vmul.f32 %v962_v31, %v962_v31  ;;  %v1474_v37 = vsel %vm1218_vm7, %v1346_v17, 0.0 }
 0x124   :  { %v4286_v6 = vld [vmem:[#allocation23_spill] sm:$0xff]  ;;  %v4287_v32 = vld [vmem:[#allocation24_spill] sm:$0xff] }
 0x125   :  { %v1977_v45 = vadd.f32 %v1976_v18, %v1463_v40  ;;  %v709_v40 = vld [vmem:[%s3908_s0 + $0x2d8] sm:$0xff]  ;;  %v964_v18 = vsub.f32 %v708_v55, %v836_v38  ;;  %v1348_v10 = vmul.f32 %v963_v8, %v963_v8  ;;  %v1475_v34 = vsel %vm1219_vm8, %v1347_v9, 0.0  ;;  %v844_v63 = vld [vmem:[%s3909_s1 + $0x310] sm:$0xff] }
 0x126   :  { %vm1224_vm13 = vcmp.lt.s32.totalorder %v4286_v6, 49152  ;;  %vm1225_vm14 = vcmp.lt.s32.totalorder %v4287_v32, 49152  ;;  %v845_v55 = vld [vmem:[%s3909_s1 + $0x318] sm:$0xff] }
 0x127   :  { %v1978_v3 = vadd.f32 %v1977_v45, %v1464_v58  ;;  %v710_v58 = vld [vmem:[%s3908_s0 + $0x2e0] sm:$0xff]  ;;  %v965_v45 = vsub.f32 %v709_v40, %v837_v52  ;;  %v1349_v11 = vmul.f32 %v964_v18, %v964_v18  ;;  %v1476_v4 = vsel %vm1220_vm9, %v1348_v10, 0.0 }
 0x128   :  { %v4288_v38 = vld [vmem:[#allocation25_spill] sm:$0xff]  ;;  %v4289_v52 = vld [vmem:[#allocation26_spill] sm:$0xff] }
 0x129   :  { %v1979_v54 = vadd.f32 %v1978_v3, %v1465_v51  ;;  %v711_v51 = vld [vmem:[%s3908_s0 + $0x2e8] sm:$0xff]  ;;  %v966_v3 = vsub.f32 %v710_v58, %v838_v62  ;;  %v1350_v12 = vmul.f32 %v965_v45, %v965_v45  ;;  %v1477_v23 = vsel %vm1221_vm10, %v1349_v11, 0.0  ;;  %v846_v40 = vld [vmem:[%s3909_s1 + $0x320] sm:$0xff] }
 0x12a   :  { %vm1226_vm15 = vcmp.lt.s32.totalorder %v4288_v38, 49152  ;;  %vm1227_vm0 = vcmp.lt.s32.totalorder %v4289_v52, 49152  ;;  %v847_v58 = vld [vmem:[%s3909_s1 + $0x328] sm:$0xff] }
 0x12b   :  { %v1980_v43 = vadd.f32 %v1979_v54, %v1466_v30  ;;  %v712_v30 = vld [vmem:[%s3908_s0 + $0x2f0] sm:$0xff]  ;;  %v967_v54 = vsub.f32 %v711_v51, %v839_v46  ;;  %v1351_v13 = vmul.f32 %v966_v3, %v966_v3  ;;  %v1478_v14 = vsel %vm1222_vm11, %v1350_v12, 0.0 }
 0x12c   :  { %v4290_v62 = vld [vmem:[#allocation27_spill] sm:$0xff]  ;;  %v4291_v46 = vld [vmem:[#allocation28_spill] sm:$0xff] }
 0x12d   :  { %v1981_v57 = vadd.f32 %v1980_v43, %v1467_v22  ;;  %v713_v22 = vld [vmem:[%s3908_s0 + $0x2f8] sm:$0xff]  ;;  %v968_v43 = vsub.f32 %v712_v30, %v840_v21  ;;  %v1352_v24 = vmul.f32 %v967_v54, %v967_v54  ;;  %v1479_v15 = vsel %vm1223_vm12, %v1351_v13, 0.0  ;;  %v848_v51 = vld [vmem:[%s3909_s1 + $0x330] sm:$0xff] }
 0x12e   :  { %vm1228_vm1 = vcmp.lt.s32.totalorder %v4290_v62, 49152  ;;  %vm1229_vm2 = vcmp.lt.s32.totalorder %v4291_v46, 49152  ;;  %v849_v30 = vld [vmem:[%s3909_s1 + $0x338] sm:$0xff] }
 0x12f   :  { %v1982_v25 = vadd.f32 %v1981_v57, %v1468_v59  ;;  %v714_v59 = vld [vmem:[%s3908_s0 + $0x300] sm:$0xff]  ;;  %v969_v57 = vsub.f32 %v713_v22, %v841_v61  ;;  %v1353_v33 = vmul.f32 %v968_v43, %v968_v43  ;;  %v1480_v16 = vsel %vm1224_vm13, %v1352_v24, 0.0 }
 0x130   :  { %v4292_v21 = vld [vmem:[#allocation29_spill] sm:$0xff]  ;;  %v4293_v61 = vld [vmem:[#allocation30_spill] sm:$0xff] }
 0x131   :  { %v1983_v7 = vadd.f32 %v1982_v25, %v1469_v28  ;;  %v715_v28 = vld [vmem:[%s3908_s0 + $0x308] sm:$0xff]  ;;  %v970_v25 = vsub.f32 %v714_v59, %v842_v5  ;;  %v1354_v31 = vmul.f32 %v969_v57, %v969_v57  ;;  %v1481_v17 = vsel %vm1225_vm14, %v1353_v33, 0.0  ;;  %v850_v22 = vld [vmem:[%s3909_s1 + $0x340] sm:$0xff] }
 0x132   :  { %vm1230_vm3 = vcmp.lt.s32.totalorder %v4292_v21, 49152  ;;  %vm1231_vm4 = vcmp.lt.s32.totalorder %v4293_v61, 49152  ;;  %v851_v59 = vld [vmem:[%s3909_s1 + $0x348] sm:$0xff] }
 0x133   :  { %v1984_v42 = vadd.f32 %v1983_v7, %v1470_v41  ;;  %v716_v41 = vld [vmem:[%s3908_s0 + $0x310] sm:$0xff]  ;;  %v971_v7 = vsub.f32 %v715_v28, %v843_v29  ;;  %v1355_v8 = vmul.f32 %v970_v25, %v970_v25  ;;  %v1482_v9 = vsel %vm1226_vm15, %v1354_v31, 0.0 }
 0x134   :  { %v4294_v5 = vld [vmem:[#allocation31_spill] sm:$0xff]  ;;  %v4295_v29 = vld [vmem:[#allocation32_spill] sm:$0xff] }
 0x135   :  { %v1985_v48 = vadd.f32 %v1984_v42, %v1471_v50  ;;  %v717_v50 = vld [vmem:[%s3908_s0 + $0x318] sm:$0xff]  ;;  %v972_v42 = vsub.f32 %v716_v41, %v844_v63  ;;  %v1356_v18 = vmul.f32 %v971_v7, %v971_v7  ;;  %v1483_v10 = vsel %vm1227_vm0, %v1355_v8, 0.0  ;;  %v852_v28 = vld [vmem:[%s3909_s1 + $0x350] sm:$0xff] }
 0x136   :  { %vm1232_vm5 = vcmp.lt.s32.totalorder %v4294_v5, 49152  ;;  %vm1233_vm6 = vcmp.lt.s32.totalorder %v4295_v29, 49152  ;;  %v853_v41 = vld [vmem:[%s3909_s1 + $0x358] sm:$0xff] }
 0x137   :  { %v1986_v19 = vadd.f32 %v1985_v48, %v1472_v49  ;;  %v718_v49 = vld [vmem:[%s3908_s0 + $0x320] sm:$0xff]  ;;  %v973_v48 = vsub.f32 %v717_v50, %v845_v55  ;;  %v1357_v45 = vmul.f32 %v972_v42, %v972_v42  ;;  %v1484_v11 = vsel %vm1228_vm1, %v1356_v18, 0.0 }
 0x138   :  { %v4296_v63 = vld [vmem:[#allocation33_spill] sm:$0xff]  ;;  %v4297_v55 = vld [vmem:[#allocation34_spill] sm:$0xff] }
 0x139   :  { %v1987_v0 = vadd.f32 %v1986_v19, %v1473_v60  ;;  %v719_v60 = vld [vmem:[%s3908_s0 + $0x328] sm:$0xff]  ;;  %v974_v19 = vsub.f32 %v718_v49, %v846_v40  ;;  %v1358_v3 = vmul.f32 %v973_v48, %v973_v48  ;;  %v1485_v12 = vsel %vm1229_vm2, %v1357_v45, 0.0  ;;  %v854_v50 = vld [vmem:[%s3909_s1 + $0x360] sm:$0xff] }
 0x13a   :  { %vm1234_vm7 = vcmp.lt.s32.totalorder %v4296_v63, 49152  ;;  %vm1235_vm8 = vcmp.lt.s32.totalorder %v4297_v55, 49152  ;;  %v855_v49 = vld [vmem:[%s3909_s1 + $0x368] sm:$0xff] }
 0x13b   :  { %v1988_v53 = vadd.f32 %v1987_v0, %v1474_v37  ;;  %v720_v37 = vld [vmem:[%s3908_s0 + $0x330] sm:$0xff]  ;;  %v975_v0 = vsub.f32 %v719_v60, %v847_v58  ;;  %v1359_v54 = vmul.f32 %v974_v19, %v974_v19  ;;  %v1486_v13 = vsel %vm1230_vm3, %v1358_v3, 0.0 }
 0x13c   :  { %v4298_v40 = vld [vmem:[#allocation35_spill] sm:$0xff]  ;;  %v4299_v58 = vld [vmem:[#allocation36_spill] sm:$0xff] }
 0x13d   :  { %v1989_v35 = vadd.f32 %v1988_v53, %v1475_v34  ;;  %v721_v34 = vld [vmem:[%s3908_s0 + $0x338] sm:$0xff]  ;;  %v976_v53 = vsub.f32 %v720_v37, %v848_v51  ;;  %v1360_v43 = vmul.f32 %v975_v0, %v975_v0  ;;  %v1487_v24 = vsel %vm1231_vm4, %v1359_v54, 0.0  ;;  %v856_v60 = vld [vmem:[%s3909_s1 + $0x370] sm:$0xff] }
 0x13e   :  { %vm1236_vm9 = vcmp.lt.s32.totalorder %v4298_v40, 49152  ;;  %vm1237_vm10 = vcmp.lt.s32.totalorder %v4299_v58, 49152  ;;  %v857_v37 = vld [vmem:[%s3909_s1 + $0x378] sm:$0xff] }
 0x13f   :  { %v1990_v44 = vadd.f32 %v1989_v35, %v1476_v4  ;;  %v722_v4 = vld [vmem:[%s3908_s0 + $0x340] sm:$0xff]  ;;  %v977_v35 = vsub.f32 %v721_v34, %v849_v30  ;;  %v1361_v57 = vmul.f32 %v976_v53, %v976_v53  ;;  %v1488_v33 = vsel %vm1232_vm5, %v1360_v43, 0.0 }
 0x140   :  { %v4300_v51 = vld [vmem:[#allocation37_spill] sm:$0xff]  ;;  %v4301_v30 = vld [vmem:[#allocation38_spill] sm:$0xff] }
 0x141   :  { %v1991_v1 = vadd.f32 %v1990_v44, %v1477_v23  ;;  %v723_v23 = vld [vmem:[%s3908_s0 + $0x348] sm:$0xff]  ;;  %v978_v44 = vsub.f32 %v722_v4, %v850_v22  ;;  %v1362_v25 = vmul.f32 %v977_v35, %v977_v35  ;;  %v1489_v31 = vsel %vm1233_vm6, %v1361_v57, 0.0  ;;  %v858_v34 = vld [vmem:[%s3909_s1 + $0x380] sm:$0xff] }
 0x142   :  { %vm1238_vm11 = vcmp.lt.s32.totalorder %v4300_v51, 49152  ;;  %vm1239_vm12 = vcmp.lt.s32.totalorder %v4301_v30, 49152  ;;  %v859_v4 = vld [vmem:[%s3909_s1 + $0x388] sm:$0xff] }
 0x143   :  { %v1992_v26 = vadd.f32 %v1991_v1, %v1478_v14  ;;  %v724_v14 = vld [vmem:[%s3908_s0 + $0x350] sm:$0xff]  ;;  %v979_v1 = vsub.f32 %v723_v23, %v851_v59  ;;  %v1363_v7 = vmul.f32 %v978_v44, %v978_v44  ;;  %v1490_v8 = vsel %vm1234_vm7, %v1362_v25, 0.0 }
 0x144   :  { %v4302_v22 = vld [vmem:[#allocation39_spill] sm:$0xff]  ;;  %v4303_v59 = vld [vmem:[#allocation40_spill] sm:$0xff] }
 0x145   :  { %v1993_v27 = vadd.f32 %v1992_v26, %v1479_v15  ;;  %v725_v15 = vld [vmem:[%s3908_s0 + $0x358] sm:$0xff]  ;;  %v980_v26 = vsub.f32 %v724_v14, %v852_v28  ;;  %v1364_v42 = vmul.f32 %v979_v1, %v979_v1  ;;  %v1491_v18 = vsel %vm1235_vm8, %v1363_v7, 0.0  ;;  %v860_v23 = vld [vmem:[%s3909_s1 + $0x390] sm:$0xff] }
 0x146   :  { %vm1240_vm13 = vcmp.lt.s32.totalorder %v4302_v22, 49152  ;;  %vm1241_vm14 = vcmp.lt.s32.totalorder %v4303_v59, 49152  ;;  %v861_v14 = vld [vmem:[%s3909_s1 + $0x398] sm:$0xff] }
 0x147   :  { %v1994_v39 = vadd.f32 %v1993_v27, %v1480_v16  ;;  %v726_v16 = vld [vmem:[%s3908_s0 + $0x360] sm:$0xff]  ;;  %v981_v27 = vsub.f32 %v725_v15, %v853_v41  ;;  %v1365_v48 = vmul.f32 %v980_v26, %v980_v26  ;;  %v1492_v45 = vsel %vm1236_vm9, %v1364_v42, 0.0 }
 0x148   :  { %v4304_v28 = vld [vmem:[#allocation41_spill] sm:$0xff]  ;;  %v4305_v41 = vld [vmem:[#allocation42_spill] sm:$0xff] }
 0x149   :  { %v1995_v2 = vadd.f32 %v1994_v39, %v1481_v17  ;;  %v727_v17 = vld [vmem:[%s3908_s0 + $0x368] sm:$0xff]  ;;  %v982_v39 = vsub.f32 %v726_v16, %v854_v50  ;;  %v1366_v19 = vmul.f32 %v981_v27, %v981_v27  ;;  %v1493_v3 = vsel %vm1237_vm10, %v1365_v48, 0.0  ;;  %v862_v15 = vld [vmem:[%s3909_s1 + $0x3a0] sm:$0xff] }
 0x14a   :  { %vm1242_vm15 = vcmp.lt.s32.totalorder %v4304_v28, 49152  ;;  %vm1243_vm0 = vcmp.lt.s32.totalorder %v4305_v41, 49152  ;;  %v863_v16 = vld [vmem:[%s3909_s1 + $0x3a8] sm:$0xff] }
 0x14b   :  { %v1996_v20 = vadd.f32 %v1995_v2, %v1482_v9  ;;  %v728_v9 = vld [vmem:[%s3908_s0 + $0x370] sm:$0xff]  ;;  %v983_v2 = vsub.f32 %v727_v17, %v855_v49  ;;  %v1367_v0 = vmul.f32 %v982_v39, %v982_v39  ;;  %v1494_v54 = vsel %vm1238_vm11, %v1366_v19, 0.0 }
 0x14c   :  { %v4306_v50 = vld [vmem:[#allocation43_spill] sm:$0xff]  ;;  %v4307_v49 = vld [vmem:[#allocation44_spill] sm:$0xff] }
 0x14d   :  { %v1997_v36 = vadd.f32 %v1996_v20, %v1483_v10  ;;  %v729_v10 = vld [vmem:[%s3908_s0 + $0x378] sm:$0xff]  ;;  %v984_v20 = vsub.f32 %v728_v9, %v856_v60  ;;  %v1368_v53 = vmul.f32 %v983_v2, %v983_v2  ;;  %v1495_v43 = vsel %vm1239_vm12, %v1367_v0, 0.0  ;;  %v864_v17 = vld [vmem:[%s3909_s1 + $0x3b0] sm:$0xff]  ;;  %v4308_v60 = vld [vmem:[#allocation46_spill] sm:$0xff] }
 0x14e   :  { %vm1244_vm1 = vcmp.lt.s32.totalorder %v4306_v50, 49152  ;;  %vm1245_vm2 = vcmp.lt.s32.totalorder %v4307_v49, 49152  ;;  %v865_v9 = vld [vmem:[%s3909_s1 + $0x3b8] sm:$0xff]  ;;  %vm1246_vm3 = vcmp.lt.s32.totalorder %v4308_v60, 49152 }
 0x14f   :  { %v1998_v47 = vadd.f32 %v1997_v36, %v1484_v11  ;;  %v730_v11 = vld [vmem:[%s3908_s0 + $0x380] sm:$0xff]  ;;  %v985_v36 = vsub.f32 %v729_v10, %v857_v37  ;;  %v1369_v35 = vmul.f32 %v984_v20, %v984_v20  ;;  %v1496_v57 = vsel %vm1240_vm13, %v1368_v53, 0.0  ;;  %v4309_v37 = vld [vmem:[#allocation47_spill] sm:$0xff] }
 0x150   :  { %v866_v10 = vld [vmem:[%s3909_s1 + $0x3c0] sm:$0xff]  ;;  %vm1247_vm4 = vcmp.lt.s32.totalorder %v4309_v37, 49152 }
 0x151   :  { %v1999_v56 = vadd.f32 %v1998_v47, %v1485_v12  ;;  %v731_v12 = vld [vmem:[%s3908_s0 + $0x388] sm:$0xff]  ;;  %v986_v47 = vsub.f32 %v730_v11, %v858_v34  ;;  %v1370_v44 = vmul.f32 %v985_v36, %v985_v36  ;;  %v1497_v25 = vsel %vm1241_vm14, %v1369_v35, 0.0  ;;  %v4310_v34 = vld [vmem:[#allocation48_spill] sm:$0xff] }
 0x152   :  { %v867_v11 = vld [vmem:[%s3909_s1 + $0x3c8] sm:$0xff]  ;;  %vm1248_vm5 = vcmp.lt.s32.totalorder %v4310_v34, 49152 }
 0x153   :  { %v2000_v6 = vadd.f32 %v1999_v56, %v1486_v13  ;;  %v732_v13 = vld [vmem:[%s3908_s0 + $0x390] sm:$0xff]  ;;  %v987_v56 = vsub.f32 %v731_v12, %v859_v4  ;;  %v1371_v1 = vmul.f32 %v986_v47, %v986_v47  ;;  %v1498_v7 = vsel %vm1242_vm15, %v1370_v44, 0.0  ;;  %v4311_v4 = vld [vmem:[#allocation49_spill] sm:$0xff] }
 0x154   :  { %v868_v12 = vld [vmem:[%s3909_s1 + $0x3d0] sm:$0xff]  ;;  %vm1249_vm6 = vcmp.lt.s32.totalorder %v4311_v4, 49152 }
 0x155   :  { %v2001_v32 = vadd.f32 %v2000_v6, %v1487_v24  ;;  %v733_v24 = vld [vmem:[%s3908_s0 + $0x398] sm:$0xff]  ;;  %v988_v6 = vsub.f32 %v732_v13, %v860_v23  ;;  %v1372_v26 = vmul.f32 %v987_v56, %v987_v56  ;;  %v1499_v42 = vsel %vm1243_vm0, %v1371_v1, 0.0  ;;  %v4312_v23 = vld [vmem:[#allocation59_spill] sm:$0xff] }
 0x156   :  { %v869_v13 = vld [vmem:[%s3909_s1 + $0x3d8] sm:$0xff]  ;;  %vm1250_vm7 = vcmp.lt.s32.totalorder %v4312_v23, 49152  ;;  %vm2040_vm0 = vcmask 0  }
 0x157   :  { %v2002_v38 = vadd.f32 %v2001_v32, %v1488_v33  ;;  %v734_v33 = vld [vmem:[%s3908_s0 + $0x3a0] sm:$0xff]  ;;  %v989_v32 = vsub.f32 %v733_v24, %v861_v14  ;;  %v1373_v27 = vmul.f32 %v988_v6, %v988_v6  ;;  %v1500_v48 = vsel %vm1244_vm1, %v1372_v26, 0.0  ;;  %v4313_v14 = vld [vmem:[#allocation60_spill] sm:$0xff] }
 0x158   :  { %v870_v24 = vld [vmem:[%s3909_s1 + $0x3e0] sm:$0xff]  ;;  %vm1251_vm8 = vcmp.lt.s32.totalorder %v4313_v14, 49152 }
 0x159   :  { %v2003_v52 = vadd.f32 %v2002_v38, %v1489_v31  ;;  %v735_v31 = vld [vmem:[%s3908_s0 + $0x3a8] sm:$0xff]  ;;  %v990_v38 = vsub.f32 %v734_v33, %v862_v15  ;;  %v1374_v39 = vmul.f32 %v989_v32, %v989_v32  ;;  %v1501_v19 = vsel %vm1245_vm2, %v1373_v27, 0.0  ;;  %v4314_v15 = vld [vmem:[#allocation61_spill] sm:$0xff] }
 0x15a   :  { %v871_v33 = vld [vmem:[%s3909_s1 + $0x3e8] sm:$0xff]  ;;  %vm1252_vm9 = vcmp.lt.s32.totalorder %v4314_v15, 49152 }
 0x15b   :  { %v2004_v62 = vadd.f32 %v2003_v52, %v1490_v8  ;;  %v736_v8 = vld [vmem:[%s3908_s0 + $0x3b0] sm:$0xff]  ;;  %v991_v52 = vsub.f32 %v735_v31, %v863_v16  ;;  %v1375_v2 = vmul.f32 %v990_v38, %v990_v38  ;;  %v1502_v0 = vsel %vm1246_vm3, %v1374_v39, 0.0  ;;  %v4315_v16 = vld [vmem:[#allocation62_spill] sm:$0xff] }
 0x15c   :  { %v872_v31 = vld [vmem:[%s3909_s1 + $0x3f0] sm:$0xff]  ;;  %vm1253_vm10 = vcmp.lt.s32.totalorder %v4315_v16, 49152 }
 0x15d   :  { %v2005_v46 = vadd.f32 %v2004_v62, %v1491_v18  ;;  %v737_v18 = vld [vmem:[%s3908_s0 + $0x3b8] sm:$0xff]  ;;  %v992_v62 = vsub.f32 %v736_v8, %v864_v17  ;;  %v1376_v20 = vmul.f32 %v991_v52, %v991_v52  ;;  %v1503_v53 = vsel %vm1247_vm4, %v1375_v2, 0.0  ;;  %v4316_v17 = vld [vmem:[#allocation63_spill] sm:$0xff] }
 0x15e   :  { %v873_v8 = vld [vmem:[%s3909_s1 + $0x3f8] sm:$0xff]  ;;  %vm1254_vm11 = vcmp.lt.s32.totalorder %v4316_v17, 49152 }
 0x15f   :  { %v2006_v21 = vadd.f32 %v2005_v46, %v1492_v45  ;;  %v738_v45 = vld [vmem:[%s3908_s0 + $0x3c0] sm:$0xff]  ;;  %v993_v46 = vsub.f32 %v737_v18, %v865_v9  ;;  %v1377_v36 = vmul.f32 %v992_v62, %v992_v62  ;;  %v1504_v35 = vsel %vm1248_vm5, %v1376_v20, 0.0  ;;  %v4320_v20 = vld [vmem:[#allocation67_spill] sm:$0xff] }
 0x160   :  { %v4318_v62 = vld [vmem:[#allocation65_spill] sm:$0xff]  ;;  %vm1258_vm15 = vcmp.lt.s32.totalorder %v4320_v20, 49152 }
 0x161   :  { %v2007_v61 = vadd.f32 %v2006_v21, %v1493_v3  ;;  %v739_v3 = vld [vmem:[%s3908_s0 + $0x3c8] sm:$0xff]  ;;  %v994_v21 = vsub.f32 %v738_v45, %v866_v10  ;;  %v1378_v47 = vmul.f32 %v993_v46, %v993_v46  ;;  %v1505_v44 = vsel %vm1249_vm6, %v1377_v36, 0.0 }
 0x162   :  { %vm1256_vm13 = vcmp.lt.s32.totalorder %v4318_v62, 49152  ;;  %v4319_v10 = vld [vmem:[#allocation66_spill] sm:$0xff] }
 0x163   :  { %v2008_v5 = vadd.f32 %v2007_v61, %v1494_v54  ;;  %v740_v54 = vld [vmem:[%s3908_s0 + $0x3d0] sm:$0xff]  ;;  %v995_v61 = vsub.f32 %v739_v3, %v867_v11  ;;  %v1379_v56 = vmul.f32 %v994_v21, %v994_v21  ;;  %v1506_v1 = vsel %vm1250_vm7, %v1378_v47, 0.0 }
 0x164   :  { %vm1257_vm14 = vcmp.lt.s32.totalorder %v4319_v10, 49152 }
 0x165   :  { %v2009_v29 = vadd.f32 %v2008_v5, %v1495_v43  ;;  %v741_v43 = vld [vmem:[%s3908_s0 + $0x3d8] sm:$0xff]  ;;  %v996_v5 = vsub.f32 %v740_v54, %v868_v12  ;;  %v1380_v6 = vmul.f32 %v995_v61, %v995_v61  ;;  %v1507_v26 = vsel %vm1251_vm8, %v1379_v56, 0.0 }
 0x167   :  { %v2010_v63 = vadd.f32 %v2009_v29, %v1496_v57  ;;  %v742_v57 = vld [vmem:[%s3908_s0 + $0x3e0] sm:$0xff]  ;;  %v997_v29 = vsub.f32 %v741_v43, %v869_v13  ;;  %v1381_v32 = vmul.f32 %v996_v5, %v996_v5  ;;  %v1508_v27 = vsel %vm1252_vm9, %v1380_v6, 0.0 }
 0x169   :  { %v2011_v55 = vadd.f32 %v2010_v63, %v1497_v25  ;;  %v743_v25 = vld [vmem:[%s3908_s0 + $0x3e8] sm:$0xff]  ;;  %v998_v63 = vsub.f32 %v742_v57, %v870_v24  ;;  %v1382_v38 = vmul.f32 %v997_v29, %v997_v29  ;;  %v1509_v39 = vsel %vm1253_vm10, %v1381_v32, 0.0 }
 0x16b   :  { %v2012_v40 = vadd.f32 %v2011_v55, %v1498_v7  ;;  %v744_v7 = vld [vmem:[%s3908_s0 + $0x3f0] sm:$0xff]  ;;  %v999_v55 = vsub.f32 %v743_v25, %v871_v33  ;;  %v1383_v52 = vmul.f32 %v998_v63, %v998_v63 }
 0x16d   :  { %v2013_v58 = vadd.f32 %v2012_v40, %v1499_v42  ;;  %v745_v42 = vld [vmem:[%s3908_s0 + $0x3f8] sm:$0xff]  ;;  %v1000_v40 = vsub.f32 %v744_v7, %v872_v31  ;;  %v1384_v60 = vmul.f32 %v999_v55, %v999_v55  ;;  %s2099_s0 = smov [#allocation3]  }
 0x16e   :  { %v1001_v9 = vsub.f32 %v745_v42, %v873_v8  ;;  %s2047_s1 = sshll.u32 %s2099_s0, 4  ;;  %s2048_s1 = int_to_ptr.vmem [resolvable:$true] %s2047_s1 }
 0x16f   :  { %v2014_v51 = vadd.f32 %v2013_v58, %v1500_v48  ;;  %v4317_v48 = vld [vmem:[#allocation64_spill] sm:$0xff]  ;;  %v1510_v58 = vsel %vm1254_vm11, %v1382_v38, 0.0  ;;  %v1512_v46 = vsel %vm1256_vm13, %v1384_v60, 0.0 }
 0x170   :  { %vm1255_vm12 = vcmp.lt.s32.totalorder %v4317_v48, 49152 }
 0x171   :  { %v2015_v30 = vadd.f32 %v2014_v51, %v1501_v19  ;;  %v1385_v19 = vmul.f32 %v1000_v40, %v1000_v40  ;;  %v1511_v45 = vsel %vm1255_vm12, %v1383_v52, 0.0  ;;  %v1386_v51 = vmul.f32 %v1001_v9, %v1001_v9 }
 0x173   :  { %v2016_v22 = vadd.f32 %v2015_v30, %v1502_v0  ;;  %v1513_v3 = vsel %vm1257_vm14, %v1385_v19, 0.0  ;;  %v1514_v34 = vsel %vm1258_vm15, %v1386_v51, 0.0 }
 0x175   :  { %v2017_v59 = vadd.f32 %v2016_v22, %v1503_v53 }
 0x177   :  { %v2018_v28 = vadd.f32 %v2017_v59, %v1504_v35 }
 0x179   :  { %v2019_v41 = vadd.f32 %v2018_v28, %v1505_v44 }
 0x17b   :  { %v2020_v50 = vadd.f32 %v2019_v41, %v1506_v1 }
 0x17d   :  { %v2021_v49 = vadd.f32 %v2020_v50, %v1507_v26 }
 0x17f   :  { %v2022_v18 = vadd.f32 %v2021_v49, %v1508_v27 }
 0x181   :  { %v2023_v2 = vadd.f32 %v2022_v18, %v1509_v39 }
 0x183   :  { %v2024_v37 = vadd.f32 %v2023_v2, %v1510_v58 }
 0x185   :  { %v2025_v0 = vadd.f32 %v2024_v37, %v1511_v45 }
 0x187   :  { %v2026_v11 = vadd.f32 %v2025_v0, %v1512_v46 }
 0x189   :  { %v2027_v30 = vadd.f32 %v2026_v11, %v1513_v3 }
 0x18b   :  { %v2028_v21 = vadd.f32 %v2027_v30, %v1514_v34 }
 0x18d   :  { %2029 = vadd.xlane.f32.xlu0 %v2028_v21 }
 0x200   :  { %v2030_v36 = vpop.xlane.xlu0 %2029 }
 0x201   :  { %v2031_v53 = vrot.slane %v2030_v36, 4 }
 0x203   :  { %v2032_v54 = vadd.f32 %v2031_v53, %v2030_v36 }
 0x205   :  { %v2033_v12 = vrot.slane %v2032_v54, 2 }
 0x207   :  { %v2034_v4 = vadd.f32 %v2033_v12, %v2032_v54 }
 0x209   :  { %v2035_v22 = vrot.slane %v2034_v4, 1 }
 0x20b   :  { %v2036_v61 = vadd.f32 %v2035_v22, %v2034_v4 }
 0x20d   :  { %2070 = vpush %v2036_v61 }
 0x23e   :  { %s2071_s20 = spop %2070 }
 0x23f   :  { %v2038_v47 = vstv %s2071_s20 }
 0x240   :  { %v2039_v35 = vmul.f32 2.0345053e-05, %v2038_v47 }
 0x242   :  { %2041 = vst.msk [vmem:[#allocation3] sm:$0x1] %vm2040_vm0, %v2039_v35 }
 0x243   :  { %2052 = dma.vmem_to_hbm [thread:$0]  %s2048_s1, 16, %s2050_s19, [#allocation4]  }
 0x244   :  { %2097 = dma.done.wait [#allocation4], 16  }
 0x245   :  { %2098 = vsyncadd [#allocation4], 4294967280 }
 0x246   :  { %2057 = vsyncpa [#allocation4], 1 }

</bundles_post_ra>
